<compile_context>
chip_gen: v5e
topology: v5e:2x2
jax: 0.10.0
libtpu: 0.0.40
codegen_flags: <defaults>
</compile_context>

<pallas_src>
import functools

import jax
import jax.numpy as jnp
from jax import lax
from jax.experimental import pallas as pl
from jax.experimental.pallas import tpu as pltpu

# ---- true (unpadded) model dims, from the PyTorch module ----
D_IN, D_H1, D_H2, D_H3, D_OUT = 330, 500, 500, 200, 3


def _pad_to(n, m):
    return ((n + m - 1) // m) * m


# ---- padded dims ----
# P_IN is only a contraction (sublane) dim -> 8-alignment is enough.
# P_H1/P_H2/P_H3 are lane dims of weights/activations AND bf16 contraction dims of the
# next layer -> keep them 128-aligned for dense (16,128) bf16 vregs (no relayouts).
P_IN  = _pad_to(D_IN, 8)      # 336
P_H1  = _pad_to(D_H1, 128)    # 512
P_H2  = _pad_to(D_H2, 128)    # 512
P_H3  = _pad_to(D_H3, 128)    # 256  (was 200/208: lane-align to avoid masked lanes)
P_OUT = _pad_to(D_OUT, 128)   # 128  (logit width inside the kernel; sliced on host)

MAX_TB = 1024   # upper bound on the batch tile (amortizes ~0.35 us per-grid-step overhead)
MIN_TB = 8


def _mlp_kernel(x_ref, w1_ref, b1_ref, w2_ref, b2_ref, w3_ref, b3_ref,
                w4_ref, b4_ref, o_ref):
    """Fused forward: 4 Linear layers + ReLU + masked log_softmax.

    x and the weights arrive as bf16; matmuls accumulate in f32 via
    preferred_element_type.  Padded weight rows/cols are zero so padding never leaks;
    the log_softmax masks the padded logit columns.  Dropout is identity at inference.
    """
    x = x_ref[...]  # already bf16 (cast fused with the pad on the host side)

    h1 = jnp.dot(x, w1_ref[...], preferred_element_type=jnp.float32) + b1_ref[...]
    h1 = jnp.maximum(h1, 0.0).astype(jnp.bfloat16)

    h2 = jnp.dot(h1, w2_ref[...], preferred_element_type=jnp.float32) + b2_ref[...]
    h2 = jnp.maximum(h2, 0.0).astype(jnp.bfloat16)

    h3 = jnp.dot(h2, w3_ref[...], preferred_element_type=jnp.float32) + b3_ref[...]
    h3 = jnp.maximum(h3, 0.0).astype(jnp.bfloat16)

    logits = jnp.dot(h3, w4_ref[...], preferred_element_type=jnp.float32) + b4_ref[...]

    # log_softmax over dim=1, restricted to the D_OUT real classes.
    col = lax.broadcasted_iota(jnp.int32, logits.shape, dimension=1)
    valid = col < D_OUT
    masked = jnp.where(valid, logits, jnp.float32(-1e30))

    m = jnp.max(masked, axis=1, keepdims=True)
    shifted = masked - m                       # padded lanes ~ -1e30 -> exp underflows to 0
    lse = jnp.log(jnp.sum(jnp.exp(shifted), axis=1, keepdims=True))

    # Lane-dense unmasked store of the full 128-wide block; host slices [:, :D_OUT].
    o_ref[...] = shifted - lse


def _choose_tile(B):
    """Pick (TB, Bp): tiles up to MAX_TB rows, but >=2 grid steps when batch allows
    (keeps both v7x TensorCores busy via dimension_semantics=('parallel',))."""
    Bp8 = _pad_to(max(B, 1), MIN_TB)
    if Bp8 <= 2 * MIN_TB:                       # tiny batch: single step
        return Bp8, Bp8
    tb = min(MAX_TB, _pad_to((Bp8 + 1) // 2, MIN_TB))
    Bp = _pad_to(Bp8, tb)
    return tb, Bp


@functools.partial(jax.jit, static_argnames=())
def net_forward(x, params):
    """x: [B, 330] float32 -> log-probabilities [B, 3] float32."""
    B = x.shape[0]
    TB, Bp = _choose_tile(B)

    # Single fused pad + bf16 cast: batch -> Bp, features -> P_IN, halves x DMA bytes.
    xp = jnp.pad(x, ((0, Bp - B), (0, P_IN - D_IN))).astype(jnp.bfloat16)

    (w1, b1, w2, b2, w3, b3, w4, b4) = params

    weight_elems = P_IN * P_H1 + P_H1 * P_H2 + P_H2 * P_H3 + P_H3 * P_OUT
    cost = pl.CostEstimate(
        flops=2 * Bp * weight_elems,
        transcendentals=Bp * (P_OUT + 1),
        bytes_accessed=(2 * weight_elems                       # bf16 weights
                        + 4 * (P_H1 + P_H2 + P_H3 + P_OUT)     # f32 biases
                        + 2 * Bp * P_IN                        # bf16 x in
                        + 4 * Bp * P_OUT),                     # f32 log-probs out (128-wide)
    )

    grid = (Bp // TB,)

    out = pl.pallas_call(
        _mlp_kernel,
        out_shape=jax.ShapeDtypeStruct((Bp, P_OUT), jnp.float32),
        grid=grid,
        in_specs=[
            pl.BlockSpec((TB, P_IN), lambda i: (i, 0)),        # x tiles over batch
            pl.BlockSpec((P_IN, P_H1), lambda i: (0, 0)),      # weights: VMEM-resident
            pl.BlockSpec((1, P_H1), lambda i: (0, 0)),
            pl.BlockSpec((P_H1, P_H2), lambda i: (0, 0)),
            pl.BlockSpec((1, P_H2), lambda i: (0, 0)),
            pl.BlockSpec((P_H2, P_H3), lambda i: (0, 0)),
            pl.BlockSpec((1, P_H3), lambda i: (0, 0)),
            pl.BlockSpec((P_H3, P_OUT), lambda i: (0, 0)),
            pl.BlockSpec((1, P_OUT), lambda i: (0, 0)),
        ],
        out_specs=pl.BlockSpec((TB, P_OUT), lambda i: (i, 0)),
        compiler_params=pltpu.CompilerParams(
            dimension_semantics=("parallel",),        # shards batch tiles across TCs (v7x)
            vmem_limit_bytes=32 * 1024 * 1024,        # headroom for TB=1024 f32 temps (v5e's
        ),                                            # scoped default is only 16 MiB)
        cost_estimate=cost,
    )(xp, w1, b1, w2, b2, w3, b3, w4, b4)

    # Slice off batch padding and the 125 padded logit lanes on the host.
    return out[:B, :D_OUT]


def init_params(key):
    """Deterministic init mimicking PyTorch's default Linear init
    (uniform in +/- 1/sqrt(fan_in)).  Weights stored as [in, out], zero-padded,
    cast to bf16 for HBM/DMA; biases stay f32 (shaped (1, P) for broadcast)."""
    def linear(key, fan_in, fan_out, p_in, p_out):
        kw, kb = jax.random.split(key)
        bound = 1.0 / jnp.sqrt(jnp.float32(fan_in))
        w = jax.random.uniform(kw, (fan_in, fan_out), jnp.float32, -bound, bound)
        b = jax.random.uniform(kb, (fan_out,), jnp.float32, -bound, bound)
        wp = jnp.zeros((p_in, p_out), jnp.float32).at[:fan_in, :fan_out].set(w)
        bp = jnp.zeros((1, p_out), jnp.float32).at[0, :fan_out].set(b)
        return wp.astype(jnp.bfloat16), bp

    k1, k2, k3, k4 = jax.random.split(key, 4)
    w1, b1 = linear(k1, D_IN, D_H1, P_IN, P_H1)
    w2, b2 = linear(k2, D_H1, D_H2, P_H1, P_H2)
    w3, b3 = linear(k3, D_H2, D_H3, P_H2, P_H3)
    w4, b4 = linear(k4, D_H3, D_OUT, P_H3, P_OUT)
    return (w1, b1, w2, b2, w3, b3, w4, b4)


def _reference_forward(x, params):
    """Pure-JAX reference (f32 activations, same bf16 weights) for a tolerance check."""
    (w1, b1, w2, b2, w3, b3, w4, b4) = params
    h = jnp.maximum(x @ w1[:D_IN, :D_H1].astype(jnp.float32) + b1[0, :D_H1], 0.0)
    h = jnp.maximum(h @ w2[:D_H1, :D_H2].astype(jnp.float32) + b2[0, :D_H2], 0.0)
    h = jnp.maximum(h @ w3[:D_H2, :D_H3].astype(jnp.float32) + b3[0, :D_H3], 0.0)
    logits = h @ w4[:D_H3, :D_OUT].astype(jnp.float32) + b4[0, :D_OUT]
    return jax.nn.log_softmax(logits, axis=1)


if __name__ == "__main__":
    key = jax.random.PRNGKey(0)
    k_params, k_x = jax.random.split(key)

    params = init_params(k_params)
    x = jax.random.normal(k_x, (4, D_IN), jnp.float32)  # small batch of 4

    out = jax.block_until_ready(net_forward(x, params))

    # sanity: shape, rows sum to ~1 in prob space, and close to a pure-JAX f32 reference
    # (bf16 intermediates -> loose tolerance, per the review's correctness note).
    assert out.shape == (4, 3)
    probs = jnp.exp(out)
    assert jnp.allclose(jnp.sum(probs, axis=1), 1.0, atol=1e-4)
    ref = _reference_forward(x, params)
    assert jnp.allclose(out, ref, atol=1e-1, rtol=1e-1)

    # TODO(synk): dropout is omitted (inference semantics, training=False).
    # TODO(synk): small-batch (grid=(1,)) latency is dominated by the ~1.2 MiB weight DMA;
    #             a cross-pallas_call weight-prefetch future (P10) would hide it in a
    #             serving loop but is not implemented here.
    print("KERNEL_OK")
</pallas_src>

<mosaic_0001>
module attributes {stable_mosaic.version = 11 : i64} {
  func.func @_mlp_kernel(%arg0: i32, %arg1: memref<8x336xbf16, #tpu.memory_space<vmem>>, %arg2: memref<336x512xbf16, #tpu.memory_space<vmem>>, %arg3: memref<1x512xf32, #tpu.memory_space<vmem>>, %arg4: memref<512x512xbf16, #tpu.memory_space<vmem>>, %arg5: memref<1x512xf32, #tpu.memory_space<vmem>>, %arg6: memref<512x256xbf16, #tpu.memory_space<vmem>>, %arg7: memref<1x256xf32, #tpu.memory_space<vmem>>, %arg8: memref<256x128xbf16, #tpu.memory_space<vmem>>, %arg9: memref<1x128xf32, #tpu.memory_space<vmem>>, %arg10: memref<8x128xf32, #tpu.memory_space<vmem>>) attributes {dimension_semantics = [#tpu.dimension_semantics<parallel>], iteration_bounds = array<i64: 1>, scalar_prefetch = 0 : i64, scratch_operands = 0 : i64, tpu.core_type = #tpu.core_type<tc>, window_params = [{transform_indices = @transform_0, window_bounds = array<i64: 8, 336>}, {pipeline_mode = #tpu.pipeline_mode<synchronous>, transform_indices = @transform_1, window_bounds = array<i64: 336, 512>}, {pipeline_mode = #tpu.pipeline_mode<synchronous>, transform_indices = @transform_2, window_bounds = array<i64: 1, 512>}, {pipeline_mode = #tpu.pipeline_mode<synchronous>, transform_indices = @transform_3, window_bounds = array<i64: 512, 512>}, {pipeline_mode = #tpu.pipeline_mode<synchronous>, transform_indices = @transform_4, window_bounds = array<i64: 1, 512>}, {pipeline_mode = #tpu.pipeline_mode<synchronous>, transform_indices = @transform_5, window_bounds = array<i64: 512, 256>}, {pipeline_mode = #tpu.pipeline_mode<synchronous>, transform_indices = @transform_6, window_bounds = array<i64: 1, 256>}, {pipeline_mode = #tpu.pipeline_mode<synchronous>, transform_indices = @transform_7, window_bounds = array<i64: 256, 128>}, {pipeline_mode = #tpu.pipeline_mode<synchronous>, transform_indices = @transform_8, window_bounds = array<i64: 1, 128>}, {transform_indices = @transform_9, window_bounds = array<i64: 8, 128>}]} {
    %c0 = arith.constant 0 : index
    %c0_0 = arith.constant 0 : index
    %0 = vector.load %arg1[%c0, %c0_0] : memref<8x336xbf16, #tpu.memory_space<vmem>>, vector<8x336xbf16>
    %c0_1 = arith.constant 0 : index
    %c0_2 = arith.constant 0 : index
    %1 = vector.load %arg2[%c0_1, %c0_2] : memref<336x512xbf16, #tpu.memory_space<vmem>>, vector<336x512xbf16>
    %cst = arith.constant dense<0.000000e+00> : vector<8x512xf32>
    %2 = tpu.matmul %0, %1, %cst {dimension_numbers = #tpu.dot_dimension_numbers<[1], [0], [0], [1], [0, 0, 1, 1], [], []>} : vector<8x336xbf16>, vector<336x512xbf16>, vector<8x512xf32> -> vector<8x512xf32>
    %c0_3 = arith.constant 0 : index
    %c0_4 = arith.constant 0 : index
    %3 = vector.load %arg3[%c0_3, %c0_4] : memref<1x512xf32, #tpu.memory_space<vmem>>, vector<1x512xf32>
    %4 = vector.broadcast %3 : vector<1x512xf32> to vector<8x512xf32>
    %5 = arith.addf %2, %4 : vector<8x512xf32>
    %cst_5 = arith.constant 0.000000e+00 : f32
    %6 = vector.broadcast %cst_5 : f32 to vector<8x512xf32>
    %7 = arith.maximumf %5, %6 : vector<8x512xf32>
    %8 = arith.truncf %7 : vector<8x512xf32> to vector<8x512xbf16>
    %c0_6 = arith.constant 0 : index
    %c0_7 = arith.constant 0 : index
    %9 = vector.load %arg4[%c0_6, %c0_7] : memref<512x512xbf16, #tpu.memory_space<vmem>>, vector<512x512xbf16>
    %cst_8 = arith.constant dense<0.000000e+00> : vector<8x512xf32>
    %10 = tpu.matmul %8, %9, %cst_8 {dimension_numbers = #tpu.dot_dimension_numbers<[1], [0], [0], [1], [0, 0, 1, 1], [], []>} : vector<8x512xbf16>, vector<512x512xbf16>, vector<8x512xf32> -> vector<8x512xf32>
    %c0_9 = arith.constant 0 : index
    %c0_10 = arith.constant 0 : index
    %11 = vector.load %arg5[%c0_9, %c0_10] : memref<1x512xf32, #tpu.memory_space<vmem>>, vector<1x512xf32>
    %12 = vector.broadcast %11 : vector<1x512xf32> to vector<8x512xf32>
    %13 = arith.addf %10, %12 : vector<8x512xf32>
    %cst_11 = arith.constant 0.000000e+00 : f32
    %14 = vector.broadcast %cst_11 : f32 to vector<8x512xf32>
    %15 = arith.maximumf %13, %14 : vector<8x512xf32>
    %16 = arith.truncf %15 : vector<8x512xf32> to vector<8x512xbf16>
    %c0_12 = arith.constant 0 : index
    %c0_13 = arith.constant 0 : index
    %17 = vector.load %arg6[%c0_12, %c0_13] : memref<512x256xbf16, #tpu.memory_space<vmem>>, vector<512x256xbf16>
    %cst_14 = arith.constant dense<0.000000e+00> : vector<8x256xf32>
    %18 = tpu.matmul %16, %17, %cst_14 {dimension_numbers = #tpu.dot_dimension_numbers<[1], [0], [0], [1], [0, 0, 1, 1], [], []>} : vector<8x512xbf16>, vector<512x256xbf16>, vector<8x256xf32> -> vector<8x256xf32>
    %c0_15 = arith.constant 0 : index
    %c0_16 = arith.constant 0 : index
    %19 = vector.load %arg7[%c0_15, %c0_16] : memref<1x256xf32, #tpu.memory_space<vmem>>, vector<1x256xf32>
    %20 = vector.broadcast %19 : vector<1x256xf32> to vector<8x256xf32>
    %21 = arith.addf %18, %20 : vector<8x256xf32>
    %cst_17 = arith.constant 0.000000e+00 : f32
    %22 = vector.broadcast %cst_17 : f32 to vector<8x256xf32>
    %23 = arith.maximumf %21, %22 : vector<8x256xf32>
    %24 = arith.truncf %23 : vector<8x256xf32> to vector<8x256xbf16>
    %c0_18 = arith.constant 0 : index
    %c0_19 = arith.constant 0 : index
    %25 = vector.load %arg8[%c0_18, %c0_19] : memref<256x128xbf16, #tpu.memory_space<vmem>>, vector<256x128xbf16>
    %cst_20 = arith.constant dense<0.000000e+00> : vector<8x128xf32>
    %26 = tpu.matmul %24, %25, %cst_20 {dimension_numbers = #tpu.dot_dimension_numbers<[1], [0], [0], [1], [0, 0, 1, 1], [], []>} : vector<8x256xbf16>, vector<256x128xbf16>, vector<8x128xf32> -> vector<8x128xf32>
    %c0_21 = arith.constant 0 : index
    %c0_22 = arith.constant 0 : index
    %27 = vector.load %arg9[%c0_21, %c0_22] : memref<1x128xf32, #tpu.memory_space<vmem>>, vector<1x128xf32>
    %28 = vector.broadcast %27 : vector<1x128xf32> to vector<8x128xf32>
    %29 = arith.addf %26, %28 : vector<8x128xf32>
    %30 = tpu.iota {dimensions = array<i32: 1>} : vector<8x128xi32>
    %c3_i32 = arith.constant 3 : i32
    %31 = vector.broadcast %c3_i32 : i32 to vector<8x128xi32>
    %32 = arith.cmpi slt, %30, %31 : vector<8x128xi32>
    %cst_23 = arith.constant -1.000000e+30 : f32
    %33 = vector.broadcast %cst_23 : f32 to vector<8x128xf32>
    %34 = arith.select %32, %29, %33 : vector<8x128xi1>, vector<8x128xf32>
    %cst_24 = arith.constant dense<0xFF800000> : vector<8xf32>
    %35 = vector.multi_reduction <maximumf>, %34, %cst_24 [1] : vector<8x128xf32> to vector<8xf32>
    %36 = vector.shape_cast %35 : vector<8xf32> to vector<8x1xf32>
    %37 = vector.broadcast %36 : vector<8x1xf32> to vector<8x128xf32>
    %38 = arith.subf %34, %37 : vector<8x128xf32>
    %39 = math.exp %38 : vector<8x128xf32>
    %cst_25 = arith.constant dense<0.000000e+00> : vector<8xf32>
    %40 = vector.multi_reduction <add>, %39, %cst_25 [1] : vector<8x128xf32> to vector<8xf32>
    %41 = vector.shape_cast %40 : vector<8xf32> to vector<8x1xf32>
    %42 = math.log %41 : vector<8x1xf32>
    %43 = vector.broadcast %42 : vector<8x1xf32> to vector<8x128xf32>
    %44 = arith.subf %38, %43 : vector<8x128xf32>
    %c0_26 = arith.constant 0 : index
    %c0_27 = arith.constant 0 : index
    %45 = vector.load %arg10[%c0_26, %c0_27] : memref<8x128xf32, #tpu.memory_space<vmem>>, vector<8x128xf32>
    tpu.vector_store %arg10[%c0_26, %c0_27], %44 {strides = array<i32>} : memref<8x128xf32, #tpu.memory_space<vmem>>, vector<8x128xf32>,
    return
  }
  func.func @transform_0(%arg0: i32) -> (i32, i32) {
    %c0_i32 = arith.constant 0 : i32
    %c0_i32_0 = arith.constant 0 : i32
    return %arg0, %c0_i32 : i32, i32
  }
  func.func @transform_1(%arg0: i32) -> (i32, i32) {
    %c0_i32 = arith.constant 0 : i32
    %c0_i32_0 = arith.constant 0 : i32
    %c0_i32_1 = arith.constant 0 : i32
    return %c0_i32, %c0_i32_0 : i32, i32
  }
  func.func @transform_2(%arg0: i32) -> (i32, i32) {
    %c0_i32 = arith.constant 0 : i32
    %c0_i32_0 = arith.constant 0 : i32
    %c0_i32_1 = arith.constant 0 : i32
    return %c0_i32, %c0_i32_0 : i32, i32
  }
  func.func @transform_3(%arg0: i32) -> (i32, i32) {
    %c0_i32 = arith.constant 0 : i32
    %c0_i32_0 = arith.constant 0 : i32
    %c0_i32_1 = arith.constant 0 : i32
    return %c0_i32, %c0_i32_0 : i32, i32
  }
  func.func @transform_4(%arg0: i32) -> (i32, i32) {
    %c0_i32 = arith.constant 0 : i32
    %c0_i32_0 = arith.constant 0 : i32
    %c0_i32_1 = arith.constant 0 : i32
    return %c0_i32, %c0_i32_0 : i32, i32
  }
  func.func @transform_5(%arg0: i32) -> (i32, i32) {
    %c0_i32 = arith.constant 0 : i32
    %c0_i32_0 = arith.constant 0 : i32
    %c0_i32_1 = arith.constant 0 : i32
    return %c0_i32, %c0_i32_0 : i32, i32
  }
  func.func @transform_6(%arg0: i32) -> (i32, i32) {
    %c0_i32 = arith.constant 0 : i32
    %c0_i32_0 = arith.constant 0 : i32
    %c0_i32_1 = arith.constant 0 : i32
    return %c0_i32, %c0_i32_0 : i32, i32
  }
  func.func @transform_7(%arg0: i32) -> (i32, i32) {
    %c0_i32 = arith.constant 0 : i32
    %c0_i32_0 = arith.constant 0 : i32
    %c0_i32_1 = arith.constant 0 : i32
    return %c0_i32, %c0_i32_0 : i32, i32
  }
  func.func @transform_8(%arg0: i32) -> (i32, i32) {
    %c0_i32 = arith.constant 0 : i32
    %c0_i32_0 = arith.constant 0 : i32
    %c0_i32_1 = arith.constant 0 : i32
    return %c0_i32, %c0_i32_0 : i32, i32
  }
  func.func @transform_9(%arg0: i32) -> (i32, i32) {
    %c0_i32 = arith.constant 0 : i32
    %c0_i32_0 = arith.constant 0 : i32
    return %arg0, %c0_i32 : i32, i32
  }
}

</mosaic_0001>

<bundles_post_ra>
// kernel: net_forward.1
= control target key start
LH: loop header
LB: loop body
LE: loop exit
PB: predicated region body
PF: predicated region fallthrough
CT: control target
= control target key end

     0   :  { %14 = vsyncpa [#allocation3], 0  ;;  %s4218_s0 = inlined_call_operand.vmem [shape: bf16[8,336], index: 0, kind: input, shape index: {}]   ;;  %s4219_s1 = inlined_call_operand.hbm [shape: bf16[336,512], index: 1, kind: input, shape index: {}]   ;;  %s4220_s2 = inlined_call_operand.vmem [shape: f32[1,512], index: 2, kind: input, shape index: {}]   ;;  %s4221_s3 = inlined_call_operand.hbm [shape: bf16[512,512], index: 3, kind: input, shape index: {}]   ;;  %s4222_s4 = inlined_call_operand.vmem [shape: f32[1,512], index: 4, kind: input, shape index: {}]   ;;  %s4223_s5 = inlined_call_operand.hbm [shape: bf16[512,256], index: 5, kind: input, shape index: {}]   ;;  %s4224_s6 = inlined_call_operand.vmem [shape: f32[1,256], index: 6, kind: input, shape index: {}]   ;;  %s4225_s7 = inlined_call_operand.hbm [shape: bf16[256,128], index: 7, kind: input, shape index: {}]   ;;  %s4226_s8 = inlined_call_operand.vmem [shape: f32[1,128], index: 8, kind: input, shape index: {}]   ;;  %s4227_s9 = inlined_call_operand.vmem [shape: f32[8,128], index: 9, kind: output, shape index: {}]  }
   0x1   :  { %15 = vsyncpa [#allocation5], 0 }
   0x2   :  { %16 = vsyncpa [#allocation8], 0  ;;  %s38_s11 = sshll.u32 %s4221_s3, 4  ;;  %s4043_s12 = smov [#allocation4]   ;;  %s39_s11 = int_to_ptr.hbm [resolvable:$true] %s38_s11 }
   0x3   :  { %s40_s13 = sshll.u32 %s4043_s12, 4  ;;  %s23_s16 = sshll.u32 %s4219_s1, 4  ;;  %s41_s13 = int_to_ptr.vmem [resolvable:$true] %s40_s13  ;;  %s24_s16 = int_to_ptr.hbm [resolvable:$true] %s23_s16 }
   0x4   :  { %s4044_s17 = smov 256   ;;  %s4045_s18 = smov 16  }
   0x5   :  { %46 = dma.hbm_to_vmem [thread:$0]  %s39_s11, 16384, %s41_s13, [#allocation5], %s4044_s17, %s4044_s17, %s4045_s18  }
   0x6   :  { %s4046_s19 = smov [#allocation2]   ;;  %s53_s23 = sshll.u32 %s4223_s5, 4  ;;  %s54_s23 = int_to_ptr.hbm [resolvable:$true] %s53_s23 }
   0x7   :  { %s25_s20 = sshll.u32 %s4046_s19, 4  ;;  %s4047_s3 = smov [#allocation6]   ;;  %s26_s20 = int_to_ptr.vmem [resolvable:$true] %s25_s20 }
   0x8   :  { %31 = dma.hbm_to_vmem [thread:$0]  %s24_s16, 10752, %s26_s20, [#allocation3], %s4044_s17, %s4044_s17, %s4045_s18  }
   0x9   :  { %s55_s24 = sshll.u32 %s4047_s3, 4  ;;  %s68_s1 = sshll.u32 %s4225_s7, 4  ;;  %s56_s24 = int_to_ptr.vmem [resolvable:$true] %s55_s24  ;;  %s69_s1 = int_to_ptr.hbm [resolvable:$true] %s68_s1 }
   0xa   :  { %s4048_s27 = smov 128   ;;  %s4049_s28 = smov 8  }
   0xb   :  { %61 = dma.hbm_to_vmem [thread:$0]  %s54_s23, 8192, %s56_s24, [#allocation5], %s4048_s27, %s4048_s27, %s4049_s28  }
   0xc   :  { %s4050_s29 = smov [#allocation7]   ;;  %s4051_s10 = smov 64  }
   0xd   :  { %s70_s30 = sshll.u32 %s4050_s29, 4  ;;  %s4052_s11 = smov 4   ;;  %s71_s30 = int_to_ptr.vmem [resolvable:$true] %s70_s30 }
   0xe   :  { %76 = dma.hbm_to_vmem [thread:$0]  %s69_s1, 2048, %s71_s30, [#allocation8], %s4051_s10, %s4051_s10, %s4052_s11  }
   0xf   :  { %4037 = dma.done.wait [#allocation3], 10752  }
  0x10   :  { %4038 = vsyncadd [#allocation3], 4294956544 }
  0x11   :  { %4039 = dma.done.wait [#allocation5], 24576  }
  0x12   :  { %4040 = vsyncadd [#allocation5], 4294942720 }
  0x13   :  { %4041 = dma.done.wait [#allocation8], 2048  }
  0x14   :  { %4042 = vsyncadd [#allocation8], 4294965248  ;;  %v2576_v0 = vld [vmem:[#allocation2 + $0xe0] sm:$0xf]  ;;  %v3664_v1 = vld [vmem:[#allocation2 + $0xec] sm:$0xf0] }
  0x15   :  { %v2784_v2 = vld [vmem:[#allocation2 + $0x280] sm:$0xf]  ;;  %v2577_v3 = vor.u32 %v3664_v1, %v2576_v0  ;;  %v3716_v4 = vld [vmem:[#allocation2 + $0x28c] sm:$0xf0]  ;;  %v3694_v33 = vld [vmem:[#allocation2 + $0x1e4] sm:$0xf] }
  0x16   :  { %v2704_v5 = vld [vmem:[#allocation2 + $0x1e0] sm:$0xf]  ;;  %v3696_v6 = vld [vmem:[#allocation2 + $0x1ec] sm:$0xf0]  ;;  %v2785_v7 = vor.u32 %v3716_v4, %v2784_v2  ;;  %v2706_v37 = vld [vmem:[#allocation2 + $0x1f0] sm:$0xf0] }
  0x17   :  { %v2705_v8 = vor.u32 %v3696_v6, %v2704_v5  ;;  %v2560_v9 = vld [vmem:[#allocation2 + $0xc0] sm:$0xf]  ;;  %v3660_v10 = vld [vmem:[#allocation2 + $0xcc] sm:$0xf0]  ;;  %626 = vmatpush.bf16.msra.mxu0 %v2577_v3  ;;  %v2709_v43 = vor.u32 %v3694_v33, %v2706_v37  ;;  %v3690_v45 = vld [vmem:[#allocation2 + $0x1c4] sm:$0xf] }
  0x18   :  { %v2768_v11 = vld [vmem:[#allocation2 + $0x260] sm:$0xf]  ;;  %v2561_v12 = vor.u32 %v3660_v10, %v2560_v9  ;;  %v3712_v13 = vld [vmem:[#allocation2 + $0x26c] sm:$0xf0]  ;;  %655 = vmatpush.bf16.msra.mxu3 %v2785_v7  ;;  %v2690_v46 = vld [vmem:[#allocation2 + $0x1d0] sm:$0xf0] }
  0x19   :  { %v2688_v14 = vld [vmem:[#allocation2 + $0x1c0] sm:$0xf]  ;;  %v3692_v15 = vld [vmem:[#allocation2 + $0x1cc] sm:$0xf0]  ;;  %639 = vmatpush.bf16.msra.mxu1 %v2705_v8  ;;  %v2769_v16 = vor.u32 %v3712_v13, %v2768_v11  ;;  %v3662_v47 = vld [vmem:[#allocation2 + $0xe4] sm:$0xf]  ;;  %678 = vmatpush.bf16.msra.mxu2 %v2709_v43  ;;  %v2693_v49 = vor.u32 %v3690_v45, %v2690_v46 }
  0x1a   :  { %v2689_v17 = vor.u32 %v3692_v15, %v2688_v14  ;;  %v2544_v18 = vld [vmem:[#allocation2 + $0xa0] sm:$0xf]  ;;  %v3656_v19 = vld [vmem:[#allocation2 + $0xac] sm:$0xf0]  ;;  %v2578_v48 = vld [vmem:[#allocation2 + $0xf0] sm:$0xf0] }
  0x1b   :  { %v2752_v20 = vld [vmem:[#allocation2 + $0x240] sm:$0xf]  ;;  %v3708_v21 = vld [vmem:[#allocation2 + $0x24c] sm:$0xf0]  ;;  %627 = vmatpush.bf16.msra.mxu0 %v2561_v12  ;;  %v2545_v24 = vor.u32 %v3656_v19, %v2544_v18  ;;  %v3686_v55 = vld [vmem:[#allocation2 + $0x1a4] sm:$0xf]  ;;  %v2581_v57 = vor.u32 %v3662_v47, %v2578_v48 }
  0x1c   :  { %v2672_v22 = vld [vmem:[#allocation2 + $0x1a0] sm:$0xf]  ;;  %v3688_v23 = vld [vmem:[#allocation2 + $0x1ac] sm:$0xf0]  ;;  %656 = vmatpush.bf16.msra.mxu3 %v2769_v16  ;;  %v2753_v25 = vor.u32 %v3708_v21, %v2752_v20  ;;  %v2674_v56 = vld [vmem:[#allocation2 + $0x1b0] sm:$0xf0] }
  0x1d   :  { %640 = vmatpush.bf16.msra.mxu1 %v2689_v17  ;;  %v2673_v26 = vor.u32 %v3688_v23, %v2672_v22  ;;  %v2528_v27 = vld [vmem:[#allocation2 + $0x80] sm:$0xf]  ;;  %v3652_v28 = vld [vmem:[#allocation2 + $0x8c] sm:$0xf0]  ;;  %v3658_v60 = vld [vmem:[#allocation2 + $0xc4] sm:$0xf]  ;;  %679 = vmatpush.bf16.msra.mxu2 %v2693_v49  ;;  %v2677_v62 = vor.u32 %v3686_v55, %v2674_v56 }
  0x1e   :  { %v2736_v29 = vld [vmem:[#allocation2 + $0x220] sm:$0xf]  ;;  %v3704_v30 = vld [vmem:[#allocation2 + $0x22c] sm:$0xf0]  ;;  %v2529_v34 = vor.u32 %v3652_v28, %v2528_v27  ;;  %v2562_v61 = vld [vmem:[#allocation2 + $0xd0] sm:$0xf0] }
  0x1f   :  { %v2656_v31 = vld [vmem:[#allocation2 + $0x180] sm:$0xf]  ;;  %v3684_v32 = vld [vmem:[#allocation2 + $0x18c] sm:$0xf0]  ;;  %628 = vmatpush.bf16.msra.mxu0 %v2545_v24  ;;  %v2737_v38 = vor.u32 %v3704_v30, %v2736_v29  ;;  %v97_v63 = vld [vmem:[%s4218_s0 + $0x8] sm:$0xf]  ;;  %v2565_v7 = vor.u32 %v3658_v60, %v2562_v61 }
  0x20   :  { %v2512_v35 = vld [vmem:[#allocation2 + $0x60] sm:$0xf]  ;;  %v3648_v36 = vld [vmem:[#allocation2 + $0x6c] sm:$0xf0]  ;;  %657 = vmatpush.bf16.msra.mxu3 %v2753_v25  ;;  %v2657_v39 = vor.u32 %v3684_v32, %v2656_v31  ;;  %v196_v3 = vunpack.c.l.b16 %v97_v63  ;;  %vm622_vm0 = vcmask 654336  }
  0x21   :  { %641 = vmatpush.bf16.msra.mxu1 %v2673_v26  ;;  %v2720_v40 = vld [vmem:[#allocation2 + $0x200] sm:$0xf]  ;;  %v3700_v41 = vld [vmem:[#allocation2 + $0x20c] sm:$0xf0]  ;;  %v2513_v50 = vor.u32 %v3648_v36, %v2512_v35  ;;  %v3682_v5 = vld [vmem:[#allocation2 + $0x184] sm:$0xf]  ;;  %680 = vmatpush.bf16.msra.mxu2 %v2677_v62 }
  0x22   :  { %v2640_v42 = vld [vmem:[#allocation2 + $0x160] sm:$0xf]  ;;  %v3680_v44 = vld [vmem:[#allocation2 + $0x16c] sm:$0xf0]  ;;  %v2721_v52 = vor.u32 %v3700_v41, %v2720_v40  ;;  %v2658_v6 = vld [vmem:[#allocation2 + $0x190] sm:$0xf0]  ;;  %v4118_v10 = vpack.c.b16 %v196_v3, %v196_v3 }
  0x23   :  { %629 = vmatpush.bf16.msra.mxu0 %v2529_v34  ;;  %v2496_v51 = vld [vmem:[#allocation2 + $0x40] sm:$0xf]  ;;  %v2641_v53 = vor.u32 %v3680_v44, %v2640_v42  ;;  %v3644_v54 = vld [vmem:[#allocation2 + $0x4c] sm:$0xf0]  ;;  %v3654_v11 = vld [vmem:[#allocation2 + $0xa4] sm:$0xf]  ;;  %v2661_v14 = vor.u32 %v3682_v5, %v2658_v6 }
  0x24   :  { %658 = vmatpush.bf16.msra.mxu3 %v2737_v38  ;;  %v2624_v58 = vld [vmem:[#allocation2 + $0x140] sm:$0xf]  ;;  %v3676_v59 = vld [vmem:[#allocation2 + $0x14c] sm:$0xf0]  ;;  %v2497_v0 = vor.u32 %v3644_v54, %v2496_v51  ;;  %v2546_v12 = vld [vmem:[#allocation2 + $0xb0] sm:$0xf0] }
  0x25   :  { %642 = vmatpush.bf16.msra.mxu1 %v2657_v39  ;;  %v2480_v1 = vld [vmem:[#allocation2 + $0x20] sm:$0xf]  ;;  %v3640_v2 = vld [vmem:[#allocation2 + $0x2c] sm:$0xf0]  ;;  %v2625_v4 = vor.u32 %v3676_v59, %v2624_v58  ;;  %v3678_v17 = vld [vmem:[#allocation2 + $0x164] sm:$0xf]  ;;  %v2549_v23 = vor.u32 %v3654_v11, %v2546_v12  ;;  %681 = vmatpush.bf16.msra.mxu2 %v2661_v14 }
  0x26   :  { %v2608_v8 = vld [vmem:[#allocation2 + $0x120] sm:$0xf]  ;;  %v3672_v9 = vld [vmem:[#allocation2 + $0x12c] sm:$0xf0]  ;;  %v2481_v15 = vor.u32 %v3640_v2, %v2480_v1  ;;  %v2642_v18 = vld [vmem:[#allocation2 + $0x170] sm:$0xf0] }
  0x27   :  { %630 = vmatpush.bf16.msra.mxu0 %v2513_v50  ;;  %v2464_v13 = vld [vmem:[#allocation2] sm:$0xf]  ;;  %v2609_v19 = vor.u32 %v3672_v9, %v2608_v8  ;;  %v3636_v20 = vld [vmem:[#allocation2 + $0xc] sm:$0xf0]  ;;  %v3650_v24 = vld [vmem:[#allocation2 + $0x84] sm:$0xf]  ;;  %v2645_v31 = vor.u32 %v3678_v17, %v2642_v18 }
  0x28   :  { %659 = vmatpush.bf16.msra.mxu3 %v2721_v52  ;;  %v96_v16 = vld [vmem:[%s4218_s0] sm:$0xff]  ;;  %v3668_v22 = vld [vmem:[#allocation2 + $0x10c] sm:$0xf0]  ;;  %v2786_v26 = vld [vmem:[#allocation2 + $0x290] sm:$0xf0]  ;;  %v2465_v32 = vor.u32 %v3636_v20, %v2464_v13 }
  0x29   :  { %643 = vmatpush.bf16.msra.mxu1 %v2641_v53  ;;  %v2592_v21 = vld [vmem:[#allocation2 + $0x100] sm:$0xf]  ;;  %v3714_v25 = vld [vmem:[#allocation2 + $0x284] sm:$0xf]  ;;  %v2530_v27 = vld [vmem:[#allocation2 + $0x90] sm:$0xf0]  ;;  %v194_v30 = vunpack.c.l.b16 %v96_v16  ;;  %v195_v33 = vunpack.c.h.b16 %v96_v16  ;;  %682 = vmatpush.bf16.msra.mxu2 %v2645_v31 }
  0x2a   :  { %v2584_v28 = vld [vmem:[#allocation2 + $0xe8] sm:$0xf]  ;;  %v3665_v29 = vld [vmem:[#allocation2 + $0xf4] sm:$0xf0]  ;;  %v3674_v34 = vld [vmem:[#allocation2 + $0x144] sm:$0xf]  ;;  %v2593_v36 = vor.u32 %v3668_v22, %v2592_v21  ;;  %v2789_v37 = vor.u32 %v3714_v25, %v2786_v26  ;;  %v2533_v38 = vor.u32 %v3650_v24, %v2530_v27 }
  0x2b   :  { %631 = vmatpush.bf16.msra.mxu0 %v2497_v0  ;;  %2798 = vmatmul.msk.bf16.vlgmr.msra.gmra.mxu3 %vm622_vm0, %v4118_v10  ;;  %v2626_v35 = vld [vmem:[#allocation2 + $0x150] sm:$0xf0]  ;;  %v2585_v39 = vor.u32 %v3665_v29, %v2584_v28  ;;  %v3646_v40 = vld [vmem:[#allocation2 + $0x64] sm:$0xf]  ;;  %v4125_v43 = vpack.c.b16 %v194_v30, %v194_v30  ;;  %v2568_v45 = vld [vmem:[#allocation2 + $0xc8] sm:$0xf]  ;;  %v4127_v48 = vpack.c.b16 %v195_v33, %v195_v33 }
  0x2c   :  { %665 = vmatpush.bf16.msrb.mxu3 %v2581_v57  ;;  %v3710_v41 = vld [vmem:[#allocation2 + $0x264] sm:$0xf]  ;;  %v2770_v42 = vld [vmem:[#allocation2 + $0x270] sm:$0xf0]  ;;  %v3661_v46 = vld [vmem:[#allocation2 + $0xd4] sm:$0xf0]  ;;  %v2629_v47 = vor.u32 %v3674_v34, %v2626_v35 }
  0x2d   :  { %644 = vmatpush.bf16.msra.mxu1 %v2625_v4  ;;  %v2514_v44 = vld [vmem:[#allocation2 + $0x70] sm:$0xf0]  ;;  %v3670_v49 = vld [vmem:[#allocation2 + $0x124] sm:$0xf]  ;;  %v2773_v51 = vor.u32 %v3710_v41, %v2770_v42  ;;  %v2569_v53 = vor.u32 %v3661_v46, %v2568_v45  ;;  %v2552_v58 = vld [vmem:[#allocation2 + $0xa8] sm:$0xf] }
  0x2e   :  { %v2610_v50 = vld [vmem:[#allocation2 + $0x130] sm:$0xf0]  ;;  %v2517_v52 = vor.u32 %v3646_v40, %v2514_v44  ;;  %v3642_v54 = vld [vmem:[#allocation2 + $0x44] sm:$0xf]  ;;  %v3657_v59 = vld [vmem:[#allocation2 + $0xb4] sm:$0xf0]  ;;  %683 = vmatpush.bf16.msra.mxu2 %v2629_v47 }
  0x2f   :  { %632 = vmatpush.bf16.msra.mxu0 %v2481_v15  ;;  %v3706_v55 = vld [vmem:[#allocation2 + $0x244] sm:$0xf]  ;;  %v2754_v56 = vld [vmem:[#allocation2 + $0x250] sm:$0xf0]  ;;  %v2613_v60 = vor.u32 %v3670_v49, %v2610_v50  ;;  %v3663_v0 = vld [vmem:[#allocation2 + $0xec] sm:$0xf]  ;;  %v2553_v3 = vor.u32 %v3657_v59, %v2552_v58 }
  0x30   :  { %666 = vmatpush.bf16.msrb.mxu3 %v2565_v7  ;;  %v2498_v57 = vld [vmem:[#allocation2 + $0x50] sm:$0xf0]  ;;  %v3666_v61 = vld [vmem:[#allocation2 + $0x104] sm:$0xf]  ;;  %v2757_v63 = vor.u32 %v3706_v55, %v2754_v56  ;;  %v2586_v1 = vld [vmem:[#allocation2 + $0xf8] sm:$0xf0] }
  0x31   :  { %645 = vmatpush.bf16.msra.mxu1 %v2609_v19  ;;  %v2594_v62 = vld [vmem:[#allocation2 + $0x110] sm:$0xf0]  ;;  %v2501_v2 = vor.u32 %v3642_v54, %v2498_v57  ;;  %v3638_v4 = vld [vmem:[#allocation2 + $0x24] sm:$0xf]  ;;  %v2536_v8 = vld [vmem:[#allocation2 + $0x88] sm:$0xf]  ;;  %v2589_v12 = vor.u32 %v3663_v0, %v2586_v1 }
  0x32   :  { %v3702_v5 = vld [vmem:[#allocation2 + $0x224] sm:$0xf]  ;;  %v2738_v6 = vld [vmem:[#allocation2 + $0x230] sm:$0xf0]  ;;  %v3653_v9 = vld [vmem:[#allocation2 + $0x94] sm:$0xf0]  ;;  %684 = vmatpush.bf16.msra.mxu2 %v2613_v60  ;;  %v2597_v11 = vor.u32 %v3666_v61, %v2594_v62 }
  0x33   :  { %633 = vmatpush.bf16.msra.mxu0 %v2465_v32  ;;  %v2482_v7 = vld [vmem:[#allocation2 + $0x30] sm:$0xf0]  ;;  %v3634_v13 = vld [vmem:[#allocation2 + $0x4] sm:$0xf]  ;;  %v2741_v14 = vor.u32 %v3702_v5, %v2738_v6  ;;  %v3659_v15 = vld [vmem:[#allocation2 + $0xcc] sm:$0xf]  ;;  %v2537_v18 = vor.u32 %v3653_v9, %v2536_v8 }
  0x34   :  { %667 = vmatpush.bf16.msrb.mxu3 %v2549_v23  ;;  %v2570_v16 = vld [vmem:[#allocation2 + $0xd8] sm:$0xf0]  ;;  %v2485_v17 = vor.u32 %v3638_v4, %v2482_v7  ;;  %v2466_v19 = vld [vmem:[#allocation2 + $0x10] sm:$0xf0]  ;;  %v3698_v20 = vld [vmem:[#allocation2 + $0x204] sm:$0xf] }
  0x35   :  { %646 = vmatpush.bf16.msra.mxu1 %v2593_v36  ;;  %v2722_v21 = vld [vmem:[#allocation2 + $0x210] sm:$0xf0]  ;;  %v2520_v22 = vld [vmem:[#allocation2 + $0x68] sm:$0xf]  ;;  %v3649_v23 = vld [vmem:[#allocation2 + $0x74] sm:$0xf0]  ;;  %v2573_v26 = vor.u32 %v3659_v15, %v2570_v16  ;;  %v2469_v32 = vor.u32 %v3634_v13, %v2466_v19 }
  0x36   :  { %634 = vmatmul.bf16.vlgmr.msra.gmra.mxu0 %v4125_v43  ;;  %v2712_v24 = vld [vmem:[#allocation2 + $0x1e8] sm:$0xf]  ;;  %685 = vmatpush.bf16.msra.mxu2 %v2597_v11  ;;  %v3697_v25 = vld [vmem:[#allocation2 + $0x1f4] sm:$0xf0]  ;;  %v2725_v29 = vor.u32 %v3698_v20, %v2722_v21  ;;  %v3655_v30 = vld [vmem:[#allocation2 + $0xac] sm:$0xf]  ;;  %v2521_v33 = vor.u32 %v3649_v23, %v2520_v22 }
  0x37   :  { %694 = vmatpush.bf16.msrb.mxu0 %v2789_v37  ;;  %v2792_v27 = vld [vmem:[#allocation2 + $0x288] sm:$0xf]  ;;  %v3717_v28 = vld [vmem:[#allocation2 + $0x294] sm:$0xf0]  ;;  %v2554_v31 = vld [vmem:[#allocation2 + $0xb8] sm:$0xf0]  ;;  %v2713_v34 = vor.u32 %v3697_v25, %v2712_v24 }
  0x38   :  { %668 = vmatpush.bf16.msrb.mxu3 %v2533_v38  ;;  %647 = vmatmul.bf16.vlgmr.msra.gmra.mxu1 %v4127_v48  ;;  %v2504_v35 = vld [vmem:[#allocation2 + $0x48] sm:$0xf]  ;;  %v3645_v36 = vld [vmem:[#allocation2 + $0x54] sm:$0xf0]  ;;  %v2793_v38 = vor.u32 %v3717_v28, %v2792_v27  ;;  %v2557_v40 = vor.u32 %v3655_v30, %v2554_v31  ;;  %v3651_v44 = vld [vmem:[#allocation2 + $0x8c] sm:$0xf] }
  0x39   :  { %704 = vmatpush.bf16.msrb.mxu1 %v2585_v39  ;;  %686 = vmatmul.bf16.vlgmr.msra.gmra.mxu2 %v4127_v48  ;;  %v2696_v37 = vld [vmem:[#allocation2 + $0x1c8] sm:$0xf]  ;;  %v3693_v39 = vld [vmem:[#allocation2 + $0x1d4] sm:$0xf0]  ;;  %v2538_v45 = vld [vmem:[#allocation2 + $0x98] sm:$0xf0]  ;;  %v2505_v46 = vor.u32 %v3645_v36, %v2504_v35 }
  0x3a   :  { %743 = vmatpush.bf16.msrb.mxu2 %v2589_v12  ;;  %v2776_v41 = vld [vmem:[#allocation2 + $0x268] sm:$0xf]  ;;  %v3713_v42 = vld [vmem:[#allocation2 + $0x274] sm:$0xf0]  ;;  %v2697_v47 = vor.u32 %v3693_v39, %v2696_v37  ;;  %v2541_v54 = vor.u32 %v3651_v44, %v2538_v45  ;;  %v3647_v57 = vld [vmem:[#allocation2 + $0x6c] sm:$0xf] }
  0x3b   :  { %695 = vmatpush.bf16.msrb.mxu0 %v2773_v51  ;;  %v2488_v49 = vld [vmem:[#allocation2 + $0x28] sm:$0xf]  ;;  %v3641_v50 = vld [vmem:[#allocation2 + $0x34] sm:$0xf0]  ;;  %v2522_v58 = vld [vmem:[#allocation2 + $0x78] sm:$0xf0] }
  0x3c   :  { %669 = vmatpush.bf16.msrb.mxu3 %v2517_v52  ;;  %v2680_v51 = vld [vmem:[#allocation2 + $0x1a8] sm:$0xf]  ;;  %v2777_v52 = vor.u32 %v3713_v42, %v2776_v41  ;;  %v3709_v56 = vld [vmem:[#allocation2 + $0x254] sm:$0xf0]  ;;  %v2489_v59 = vor.u32 %v3641_v50, %v2488_v49  ;;  %v2525_v4 = vor.u32 %v3647_v57, %v2522_v58  ;;  %v3643_v5 = vld [vmem:[#allocation2 + $0x4c] sm:$0xf] }
  0x3d   :  { %705 = vmatpush.bf16.msrb.mxu1 %v2569_v53  ;;  %v3689_v53 = vld [vmem:[#allocation2 + $0x1b4] sm:$0xf0]  ;;  %v2760_v55 = vld [vmem:[#allocation2 + $0x248] sm:$0xf]  ;;  %v2506_v6 = vld [vmem:[#allocation2 + $0x58] sm:$0xf0] }
  0x3e   :  { %744 = vmatpush.bf16.msrb.mxu2 %v2573_v26  ;;  %v2472_v60 = vld [vmem:[#allocation2 + $0x8] sm:$0xf]  ;;  %v3637_v61 = vld [vmem:[#allocation2 + $0x14] sm:$0xf0]  ;;  %v2681_v62 = vor.u32 %v3689_v53, %v2680_v51  ;;  %v2761_v1 = vor.u32 %v3709_v56, %v2760_v55  ;;  %v3691_v15 = vld [vmem:[#allocation2 + $0x1cc] sm:$0xf] }
  0x3f   :  { %696 = vmatpush.bf16.msrb.mxu0 %v2757_v63  ;;  %v2664_v63 = vld [vmem:[#allocation2 + $0x188] sm:$0xf]  ;;  %v3685_v0 = vld [vmem:[#allocation2 + $0x194] sm:$0xf0]  ;;  %v2473_v9 = vor.u32 %v3637_v61, %v2472_v60  ;;  %v2698_v16 = vld [vmem:[#allocation2 + $0x1d8] sm:$0xf0] }
  0x40   :  { %670 = vmatpush.bf16.msrb.mxu3 %v2501_v2  ;;  %v3695_v2 = vld [vmem:[#allocation2 + $0x1ec] sm:$0xf]  ;;  %v2744_v7 = vld [vmem:[#allocation2 + $0x228] sm:$0xf]  ;;  %v3705_v8 = vld [vmem:[#allocation2 + $0x234] sm:$0xf0]  ;;  %v2665_v11 = vor.u32 %v3685_v0, %v2664_v63  ;;  %v2701_v24 = vor.u32 %v3691_v15, %v2698_v16 }
  0x41   :  { %706 = vmatpush.bf16.msrb.mxu1 %v2553_v3  ;;  %v2714_v3 = vld [vmem:[#allocation2 + $0x1f8] sm:$0xf0]  ;;  %v2648_v13 = vld [vmem:[#allocation2 + $0x168] sm:$0xf]  ;;  %v2745_v19 = vor.u32 %v3705_v8, %v2744_v7  ;;  %v3701_v22 = vld [vmem:[#allocation2 + $0x214] sm:$0xf0] }
  0x42   :  { %745 = vmatpush.bf16.msrb.mxu2 %v2557_v40  ;;  %v2717_v12 = vor.u32 %v3695_v2, %v2714_v3  ;;  %v2490_v20 = vld [vmem:[#allocation2 + $0x38] sm:$0xf0]  ;;  %v2728_v21 = vld [vmem:[#allocation2 + $0x208] sm:$0xf]  ;;  %v3677_v26 = vld [vmem:[#allocation2 + $0x154] sm:$0xf0] }
  0x43   :  { %697 = vmatpush.bf16.msrb.mxu0 %v2741_v14  ;;  %v3681_v14 = vld [vmem:[#allocation2 + $0x174] sm:$0xf0]  ;;  %v2632_v25 = vld [vmem:[#allocation2 + $0x148] sm:$0xf]  ;;  %v3687_v27 = vld [vmem:[#allocation2 + $0x1ac] sm:$0xf]  ;;  %v2729_v30 = vor.u32 %v3701_v22, %v2728_v21 }
  0x44   :  { %671 = vmatpush.bf16.msrb.mxu3 %v2485_v17  ;;  %v2509_v17 = vor.u32 %v3643_v5, %v2506_v6  ;;  %v2649_v23 = vor.u32 %v3681_v14, %v2648_v13  ;;  %v2682_v28 = vld [vmem:[#allocation2 + $0x1b8] sm:$0xf0]  ;;  %v3635_v31 = vld [vmem:[#allocation2 + $0xc] sm:$0xf]  ;;  %v2633_v35 = vor.u32 %v3677_v26, %v2632_v25  ;;  %v2916_v37 = vld [vmem:[#allocation4 + $0xe0] sm:$0xf] }
  0x45   :  { %707 = vmatpush.bf16.msrb.mxu1 %v2537_v18  ;;  %v3639_v18 = vld [vmem:[#allocation2 + $0x2c] sm:$0xf]  ;;  %v2685_v36 = vor.u32 %v3687_v27, %v2682_v28  ;;  %v2900_v39 = vld [vmem:[#allocation4 + $0xc0] sm:$0xf]  ;;  %v2666_v41 = vld [vmem:[#allocation2 + $0x198] sm:$0xf0] }
  0x46   :  { %746 = vmatpush.bf16.msrb.mxu2 %v2541_v54  ;;  %v3683_v40 = vld [vmem:[#allocation2 + $0x18c] sm:$0xf]  ;;  %v3744_v45 = vld [vmem:[#allocation4 + $0xcc] sm:$0xf0]  ;;  %v2884_v51 = vld [vmem:[#allocation4 + $0xa0] sm:$0xf] }
  0x47   :  { %698 = vmatpush.bf16.msrb.mxu0 %v2725_v29  ;;  %v2493_v29 = vor.u32 %v3639_v18, %v2490_v20  ;;  %v3679_v49 = vld [vmem:[#allocation2 + $0x16c] sm:$0xf]  ;;  %v2901_v50 = vor.u32 %v3744_v45, %v2900_v39  ;;  %v2669_v53 = vor.u32 %v3683_v40, %v2666_v41  ;;  %v3740_v54 = vld [vmem:[#allocation4 + $0xac] sm:$0xf0]  ;;  %v3044_v55 = vld [vmem:[#allocation4 + $0x1e0] sm:$0xf] }
  0x48   :  { %672 = vmatpush.bf16.msrb.mxu3 %v2469_v32  ;;  %v2474_v32 = vld [vmem:[#allocation2 + $0x18] sm:$0xf0]  ;;  %v3780_v56 = vld [vmem:[#allocation4 + $0x1ec] sm:$0xf0]  ;;  %v3715_v61 = vld [vmem:[#allocation2 + $0x28c] sm:$0xf]  ;;  %v2885_v63 = vor.u32 %v3740_v54, %v2884_v51 }
  0x49   :  { %708 = vmatpush.bf16.msrb.mxu1 %v2521_v33  ;;  %v2616_v33 = vld [vmem:[#allocation2 + $0x128] sm:$0xf]  ;;  %v2477_v42 = vor.u32 %v3635_v31, %v2474_v32  ;;  %v2650_v57 = vld [vmem:[#allocation2 + $0x178] sm:$0xf0]  ;;  %v3045_v58 = vor.u32 %v3780_v56, %v3044_v55  ;;  %v3776_v60 = vld [vmem:[#allocation4 + $0x1cc] sm:$0xf0] }
  0x4a   :  { %2799 = vmatmul.msk.bf16.vlgmr.msrb.gmra.mxu0 %vm622_vm0, %v4118_v10  ;;  %747 = vmatpush.bf16.msrb.mxu2 %v2525_v4  ;;  %v2653_v2 = vor.u32 %v3679_v49, %v2650_v57  ;;  %v3675_v3 = vld [vmem:[#allocation2 + $0x14c] sm:$0xf]  ;;  %v2868_v4 = vld [vmem:[#allocation4 + $0x80] sm:$0xf]  ;;  %v3736_v5 = vld [vmem:[#allocation4 + $0x8c] sm:$0xf0] }
  0x4b   :  { %733 = vmatpush.bf16.msra.mxu0 %v2793_v38  ;;  %673 = vmatmul.bf16.vlgmr.msrb.gmra.mxu3 %v4125_v43  ;;  %v3748_v38 = vld [vmem:[#allocation4 + $0xec] sm:$0xf0]  ;;  %v2634_v7 = vld [vmem:[#allocation2 + $0x158] sm:$0xf0]  ;;  %v3012_v8 = vld [vmem:[#allocation4 + $0x1a0] sm:$0xf]  ;;  %v2869_v13 = vor.u32 %v3736_v5, %v2868_v4 }
  0x4c   :  { %717 = vmatpush.bf16.msra.mxu3 %v2713_v34  ;;  %v3673_v34 = vld [vmem:[#allocation2 + $0x134] sm:$0xf0]  ;;  %v2917_v44 = vor.u32 %v3748_v38, %v2916_v37  ;;  %v2637_v14 = vor.u32 %v3675_v3, %v2634_v7  ;;  %v3671_v15 = vld [vmem:[#allocation2 + $0x12c] sm:$0xf]  ;;  %v2852_v16 = vld [vmem:[#allocation4 + $0x60] sm:$0xf] }
  0x4d   :  { %709 = vmatpush.bf16.msrb.mxu1 %v2505_v46  ;;  %v2600_v46 = vld [vmem:[#allocation2 + $0x108] sm:$0xf]  ;;  %v2618_v20 = vld [vmem:[#allocation2 + $0x138] sm:$0xf0]  ;;  %v2996_v21 = vld [vmem:[#allocation4 + $0x180] sm:$0xf] }
  0x4e   :  { %748 = vmatpush.bf16.msrb.mxu2 %v2509_v17  ;;  %v3732_v17 = vld [vmem:[#allocation4 + $0x6c] sm:$0xf0]  ;;  %v2621_v25 = vor.u32 %v3671_v15, %v2618_v20  ;;  %v3667_v26 = vld [vmem:[#allocation2 + $0x10c] sm:$0xf]  ;;  %v2836_v27 = vld [vmem:[#allocation4 + $0x40] sm:$0xf] }
  0x4f   :  { %734 = vmatpush.bf16.msra.mxu0 %v2777_v52  ;;  %v2617_v52 = vor.u32 %v3673_v34, %v2616_v33  ;;  %v3768_v22 = vld [vmem:[#allocation4 + $0x18c] sm:$0xf0]  ;;  %v2602_v31 = vld [vmem:[#allocation2 + $0x118] sm:$0xf0]  ;;  %v2980_v32 = vld [vmem:[#allocation4 + $0x160] sm:$0xf] }
  0x50   :  { %718 = vmatpush.bf16.msra.mxu3 %v2697_v47  ;;  %v3669_v47 = vld [vmem:[#allocation2 + $0x114] sm:$0xf0]  ;;  %v3728_v28 = vld [vmem:[#allocation4 + $0x4c] sm:$0xf0]  ;;  %v3703_v34 = vld [vmem:[#allocation2 + $0x22c] sm:$0xf]  ;;  %v2605_v37 = vor.u32 %v3667_v26, %v2602_v31 }
  0x51   :  { %710 = vmatpush.bf16.msrb.mxu1 %v2489_v59  ;;  %v3028_v59 = vld [vmem:[#allocation4 + $0x1c0] sm:$0xf]  ;;  %v3764_v33 = vld [vmem:[#allocation4 + $0x16c] sm:$0xf0]  ;;  %v3699_v45 = vld [vmem:[#allocation2 + $0x20c] sm:$0xf] }
  0x52   :  { %749 = vmatpush.bf16.msrb.mxu2 %v2493_v29  ;;  %v3029_v0 = vor.u32 %v3776_v60, %v3028_v59  ;;  %v2997_v29 = vor.u32 %v3768_v22, %v2996_v21  ;;  %v2820_v38 = vld [vmem:[#allocation4 + $0x20] sm:$0xf]  ;;  %v3724_v39 = vld [vmem:[#allocation4 + $0x2c] sm:$0xf0]  ;;  %v2981_v40 = vor.u32 %v3764_v33, %v2980_v32  ;;  %v2918_v54 = vld [vmem:[#allocation4 + $0xf0] sm:$0xf0] }
  0x53   :  { %735 = vmatpush.bf16.msra.mxu0 %v2761_v1  ;;  %v2601_v1 = vor.u32 %v3669_v47, %v2600_v46  ;;  %v2730_v46 = vld [vmem:[#allocation2 + $0x218] sm:$0xf0]  ;;  %v2821_v47 = vor.u32 %v3724_v39, %v2820_v38  ;;  %v2804_v49 = vld [vmem:[#allocation4] sm:$0xf]  ;;  %v3742_v57 = vld [vmem:[#allocation4 + $0xc4] sm:$0xf] }
  0x54   :  { %719 = vmatpush.bf16.msra.mxu3 %v2681_v62  ;;  %v2794_v62 = vld [vmem:[#allocation2 + $0x298] sm:$0xf0]  ;;  %v3738_v60 = vld [vmem:[#allocation4 + $0xa4] sm:$0xf]  ;;  %v2948_v4 = vld [vmem:[#allocation4 + $0x120] sm:$0xf] }
  0x55   :  { %711 = vmatpush.bf16.msrb.mxu1 %v2473_v9  ;;  %v2797_v6 = vor.u32 %v3715_v61, %v2794_v62  ;;  %v3772_v9 = vld [vmem:[#allocation4 + $0x1ac] sm:$0xf0]  ;;  %v2886_v61 = vld [vmem:[#allocation4 + $0xb0] sm:$0xf0]  ;;  %v3726_v7 = vld [vmem:[#allocation4 + $0x44] sm:$0xf] }
  0x56   :  { %750 = vmatpush.bf16.msrb.mxu2 %v2477_v42  ;;  %v3013_v18 = vor.u32 %v3772_v9, %v3012_v8  ;;  %v2964_v42 = vld [vmem:[#allocation4 + $0x140] sm:$0xf]  ;;  %v2889_v62 = vor.u32 %v3738_v60, %v2886_v61  ;;  %v3756_v5 = vld [vmem:[#allocation4 + $0x12c] sm:$0xf0]  ;;  %v2822_v20 = vld [vmem:[#allocation4 + $0x30] sm:$0xf0] }
  0x57   :  { %736 = vmatpush.bf16.msra.mxu0 %v2745_v19  ;;  %v3172_v9 = vld [vmem:[#allocation4 + $0x2e0] sm:$0xf]  ;;  %v3804_v31 = vld [vmem:[#allocation4 + $0x2ac] sm:$0xf0]  ;;  %v3770_v33 = vld [vmem:[#allocation4 + $0x1a4] sm:$0xf] }
  0x58   :  { %720 = vmatpush.bf16.msra.mxu3 %v2665_v11  ;;  %712 = vmatmul.bf16.vlgmr.msrb.gmra.mxu1 %v4125_v43  ;;  %v3711_v11 = vld [vmem:[#allocation2 + $0x26c] sm:$0xf]  ;;  %v3156_v22 = vld [vmem:[#allocation4 + $0x2c0] sm:$0xf]  ;;  %v3766_v39 = vld [vmem:[#allocation4 + $0x184] sm:$0xf] }
  0x59   :  { %756 = vmatpush.bf16.msra.mxu1 %v2717_v12  ;;  %751 = vmatmul.bf16.vlgmr.msrb.gmra.mxu2 %v4125_v43  ;;  %v2778_v12 = vld [vmem:[#allocation2 + $0x278] sm:$0xf0]  ;;  %v3707_v43 = vld [vmem:[#allocation2 + $0x24c] sm:$0xf]  ;;  %v2966_v60 = vld [vmem:[#allocation4 + $0x150] sm:$0xf0] }
  0x5a   :  { %1581 = vmatpush.bf16.msra.mxu2 %v3045_v58  ;;  %v2781_v19 = vor.u32 %v3711_v11, %v2778_v12  ;;  %v2902_v58 = vld [vmem:[#allocation4 + $0xd0] sm:$0xf0]  ;;  %v3812_v11 = vld [vmem:[#allocation4 + $0x2ec] sm:$0xf0] }
  0x5b   :  { %737 = vmatpush.bf16.msra.mxu0 %v2729_v30  ;;  %v2905_v59 = vor.u32 %v3742_v57, %v2902_v58  ;;  %v3173_v12 = vor.u32 %v3812_v11, %v3172_v9  ;;  %v3792_v57 = vld [vmem:[#allocation4 + $0x24c] sm:$0xf0] }
  0x5c   :  { %721 = vmatpush.bf16.msra.mxu3 %v2649_v23  ;;  %v2762_v23 = vld [vmem:[#allocation2 + $0x258] sm:$0xf0] }
  0x5d   :  { %757 = vmatpush.bf16.msra.mxu1 %v2701_v24  ;;  %v2853_v24 = vor.u32 %v3732_v17, %v2852_v16  ;;  %v2765_v30 = vor.u32 %v3707_v43, %v2762_v23  ;;  %v3778_v16 = vld [vmem:[#allocation4 + $0x1e4] sm:$0xf]  ;;  %v3046_v17 = vld [vmem:[#allocation4 + $0x1f0] sm:$0xf0]  ;;  %v3808_v43 = vld [vmem:[#allocation4 + $0x2cc] sm:$0xf0] }
  0x5e   :  { %2800 = vmatmul.msk.bf16.vlgmr.msra.gmra.mxu0 %vm622_vm0, %v4118_v10  ;;  %1582 = vmatpush.bf16.msra.mxu2 %v3029_v0  ;;  %v2870_v0 = vld [vmem:[#allocation4 + $0x90] sm:$0xf0]  ;;  %v3157_v23 = vor.u32 %v3808_v43, %v3156_v22  ;;  %v3236_v22 = vld [vmem:[#allocation4 + $0x360] sm:$0xf]  ;;  %v3828_v43 = vld [vmem:[#allocation4 + $0x36c] sm:$0xf0] }
  0x5f   :  { %1568 = vmatpush.bf16.msrb.mxu0 %v2917_v44  ;;  %v3760_v44 = vld [vmem:[#allocation4 + $0x14c] sm:$0xf0] }
  0x60   :  { %722 = vmatpush.bf16.msra.mxu3 %v2633_v35  ;;  %v2746_v35 = vld [vmem:[#allocation2 + $0x238] sm:$0xf0]  ;;  %v2965_v51 = vor.u32 %v3760_v44, %v2964_v42  ;;  %v3300_v42 = vld [vmem:[#allocation4 + $0x3e0] sm:$0xf]  ;;  %v3844_v44 = vld [vmem:[#allocation4 + $0x3ec] sm:$0xf0] }
  0x61   :  { %758 = vmatpush.bf16.msra.mxu1 %v2685_v36  ;;  %v2837_v36 = vor.u32 %v3728_v28, %v2836_v27  ;;  %v2749_v41 = vor.u32 %v3703_v34, %v2746_v35  ;;  %v3718_v27 = vld [vmem:[#allocation4 + $0x4] sm:$0xf]  ;;  %v2806_v28 = vld [vmem:[#allocation4 + $0x10] sm:$0xf0] }
  0x62   :  { %1583 = vmatpush.bf16.msra.mxu2 %v3013_v18  ;;  %v3049_v18 = vor.u32 %v3778_v16, %v3046_v17  ;;  %v3014_v34 = vld [vmem:[#allocation4 + $0x1b0] sm:$0xf0] }
  0x63   :  { %1569 = vmatpush.bf16.msrb.mxu0 %v2901_v50  ;;  %v3720_v50 = vld [vmem:[#allocation4 + $0xc] sm:$0xf0]  ;;  %v3017_v35 = vor.u32 %v3770_v33, %v3014_v34  ;;  %v3174_v16 = vld [vmem:[#allocation4 + $0x2f0] sm:$0xf0]  ;;  %v2924_v34 = vld [vmem:[#allocation4 + $0xe8] sm:$0xf] }
  0x64   :  { %723 = vmatpush.bf16.msra.mxu3 %v2617_v52  ;;  %v2733_v52 = vor.u32 %v3699_v45, %v2730_v46  ;;  %v2805_v55 = vor.u32 %v3720_v50, %v2804_v49  ;;  %v3108_v45 = vld [vmem:[#allocation4 + $0x260] sm:$0xf]  ;;  %v3301_v46 = vor.u32 %v3844_v44, %v3300_v42  ;;  %v3762_v50 = vld [vmem:[#allocation4 + $0x164] sm:$0xf] }
  0x65   :  { %759 = vmatpush.bf16.msra.mxu1 %v2669_v53  ;;  %v3746_v53 = vld [vmem:[#allocation4 + $0xe4] sm:$0xf] }
  0x66   :  { %1584 = vmatpush.bf16.msra.mxu2 %v2997_v29  ;;  %v2921_v56 = vor.u32 %v3746_v53, %v2918_v54  ;;  %v2809_v29 = vor.u32 %v3718_v27, %v2806_v28  ;;  %v3284_v53 = vld [vmem:[#allocation4 + $0x3c0] sm:$0xf]  ;;  %v3840_v54 = vld [vmem:[#allocation4 + $0x3cc] sm:$0xf0]  ;;  %v3806_v28 = vld [vmem:[#allocation4 + $0x2c4] sm:$0xf] }
  0x67   :  { %1570 = vmatpush.bf16.msrb.mxu0 %v2885_v63  ;;  %v3734_v63 = vld [vmem:[#allocation4 + $0x84] sm:$0xf] }
  0x68   :  { %724 = vmatpush.bf16.msra.mxu3 %v2601_v1  ;;  %v3730_v1 = vld [vmem:[#allocation4 + $0x64] sm:$0xf] }
  0x69   :  { %760 = vmatpush.bf16.msra.mxu1 %v2653_v2  ;;  %v2854_v2 = vld [vmem:[#allocation4 + $0x70] sm:$0xf0] }
  0x6a   :  { %1585 = vmatpush.bf16.msra.mxu2 %v2981_v40  ;;  %v2857_v3 = vor.u32 %v3730_v1, %v2854_v2  ;;  %v2998_v40 = vld [vmem:[#allocation4 + $0x190] sm:$0xf0]  ;;  %v3788_v1 = vld [vmem:[#allocation4 + $0x22c] sm:$0xf0]  ;;  %v4146_v2 = vld [vmem:[%s4220_s2] sm:$0xf] }
  0x6b   :  { %725 = vmatmul.bf16.vlgmr.msra.gmra.mxu3 %v4127_v48  ;;  %1571 = vmatpush.bf16.msrb.mxu0 %v2869_v13  ;;  %v2932_v13 = vld [vmem:[#allocation4 + $0x100] sm:$0xf]  ;;  %v184_v9 = vperm.slane %v4146_v2, 0 }
  0x6c   :  { %772 = vmatpush.bf16.msrb.mxu3 %v2797_v6  ;;  %v2949_v6 = vor.u32 %v3756_v5, %v2948_v4  ;;  %v3754_v5 = vld [vmem:[#allocation4 + $0x124] sm:$0xf] }
  0x6d   :  { %761 = vmatpush.bf16.msra.mxu1 %v2637_v14  ;;  %v3752_v14 = vld [vmem:[#allocation4 + $0x10c] sm:$0xf0] }
  0x6e   :  { %1586 = vmatpush.bf16.msra.mxu2 %v2965_v51  ;;  %v2933_v15 = vor.u32 %v3752_v14, %v2932_v13  ;;  %v2982_v51 = vld [vmem:[#allocation4 + $0x170] sm:$0xf0]  ;;  %v3784_v13 = vld [vmem:[#allocation4 + $0x20c] sm:$0xf0] }
  0x6f   :  { %1572 = vmatpush.bf16.msrb.mxu0 %v2853_v24  ;;  %v3774_v24 = vld [vmem:[#allocation4 + $0x1c4] sm:$0xf] }
  0x70   :  { %773 = vmatpush.bf16.msrb.mxu3 %v2781_v19  ;;  %v3722_v19 = vld [vmem:[#allocation4 + $0x24] sm:$0xf] }
  0x71   :  { %762 = vmatpush.bf16.msra.mxu1 %v2621_v25  ;;  %v2825_v21 = vor.u32 %v3722_v19, %v2822_v20  ;;  %v3030_v25 = vld [vmem:[#allocation4 + $0x1d0] sm:$0xf0] }
  0x72   :  { %1587 = vmatpush.bf16.msra.mxu2 %v2949_v6  ;;  %v3033_v26 = vor.u32 %v3774_v24, %v3030_v25  ;;  %v2950_v6 = vld [vmem:[#allocation4 + $0x130] sm:$0xf0]  ;;  %v3237_v25 = vor.u32 %v3828_v43, %v3236_v22 }
  0x73   :  { %1573 = vmatpush.bf16.msrb.mxu0 %v2837_v36  ;;  %v3124_v36 = vld [vmem:[#allocation4 + $0x280] sm:$0xf]  ;;  %v2934_v19 = vld [vmem:[#allocation4 + $0x110] sm:$0xf0] }
  0x74   :  { %774 = vmatpush.bf16.msrb.mxu3 %v2765_v30  ;;  %v3140_v30 = vld [vmem:[#allocation4 + $0x2a0] sm:$0xf]  ;;  %v3078_v22 = vld [vmem:[#allocation4 + $0x230] sm:$0xf0] }
  0x75   :  { %763 = vmatpush.bf16.msra.mxu1 %v2605_v37  ;;  %v3141_v32 = vor.u32 %v3804_v31, %v3140_v30  ;;  %v3800_v37 = vld [vmem:[#allocation4 + $0x28c] sm:$0xf0]  ;;  %v3220_v31 = vld [vmem:[#allocation4 + $0x340] sm:$0xf] }
  0x76   :  { %1588 = vmatpush.bf16.msra.mxu2 %v2933_v15  ;;  %v3125_v38 = vor.u32 %v3800_v37, %v3124_v36  ;;  %v3810_v15 = vld [vmem:[#allocation4 + $0x2e4] sm:$0xf] }
  0x77   :  { %1574 = vmatpush.bf16.msrb.mxu0 %v2821_v47  ;;  %v3796_v47 = vld [vmem:[#allocation4 + $0x26c] sm:$0xf0]  ;;  %v3177_v17 = vor.u32 %v3810_v15, %v3174_v16  ;;  %v185_v15 = vperm.slane %v4146_v2, 1  ;;  %v2860_v16 = vld [vmem:[#allocation4 + $0x68] sm:$0xf] }
  0x78   :  { %775 = vmatpush.bf16.msrb.mxu3 %v2749_v41  ;;  %764 = vmatmul.bf16.vlgmr.msra.gmra.mxu1 %v4127_v48  ;;  %v2873_v48 = vor.u32 %v3734_v63, %v2870_v0  ;;  %v3001_v41 = vor.u32 %v3766_v39, %v2998_v40  ;;  %v3109_v49 = vor.u32 %v3796_v47, %v3108_v45  ;;  %v3836_v63 = vld [vmem:[#allocation4 + $0x3ac] sm:$0xf0]  ;;  %v3142_v39 = vld [vmem:[#allocation4 + $0x2b0] sm:$0xf0] }
  0x79   :  { %1607 = vmatpush.bf16.msrb.mxu1 %v3301_v46  ;;  %v3745_v46 = vld [vmem:[#allocation4 + $0xd4] sm:$0xf0] }
  0x7a   :  { %1633 = vmatpush.bf16.msrb.mxu2 %v3049_v18  ;;  %v3750_v18 = vld [vmem:[#allocation4 + $0x104] sm:$0xf] }
  0x7b   :  { %1575 = vmatpush.bf16.msrb.mxu0 %v2805_v55  ;;  %v3285_v55 = vor.u32 %v3840_v54, %v3284_v53  ;;  %v3126_v53 = vld [vmem:[#allocation4 + $0x290] sm:$0xf0] }
  0x7c   :  { %776 = vmatpush.bf16.msrb.mxu3 %v2733_v52  ;;  %v2985_v52 = vor.u32 %v3762_v50, %v2982_v51  ;;  %v3820_v50 = vld [vmem:[#allocation4 + $0x32c] sm:$0xf0] }
  0x7d   :  { %1608 = vmatpush.bf16.msrb.mxu1 %v3285_v55  ;;  %v2892_v55 = vld [vmem:[#allocation4 + $0xa8] sm:$0xf] }
  0x7e   :  { %1634 = vmatpush.bf16.msrb.mxu2 %v3033_v26 }
  0x7f   :  { %2801 = vmatmul.msk.bf16.vlgmr.msrb.gmra.mxu3 %vm622_vm0, %v4118_v10  ;;  %1620 = vmatpush.bf16.msra.mxu0 %v2921_v56  ;;  %v2838_v10 = vld [vmem:[#allocation4 + $0x50] sm:$0xf0]  ;;  %v3092_v56 = vld [vmem:[#allocation4 + $0x240] sm:$0xf] }
  0x80   :  { %v2841_v8 = vor.u32 %v3726_v7, %v2838_v10  ;;  %1594 = vmatpush.bf16.msra.mxu3 %v3173_v12  ;;  %v3093_v58 = vor.u32 %v3792_v57, %v3092_v56  ;;  %v2953_v7 = vor.u32 %v3754_v5, %v2950_v6  ;;  %v3252_v10 = vld [vmem:[#allocation4 + $0x380] sm:$0xf]  ;;  %v3741_v57 = vld [vmem:[#allocation4 + $0xb4] sm:$0xf0] }
  0x81   :  { %v3060_v12 = vld [vmem:[#allocation4 + $0x200] sm:$0xf]  ;;  %v3737_v5 = vld [vmem:[#allocation4 + $0x94] sm:$0xf0] }
  0x82   :  { %1635 = vmatpush.bf16.msrb.mxu2 %v3017_v35  ;;  %v3061_v14 = vor.u32 %v3784_v13, %v3060_v12  ;;  %v3749_v35 = vld [vmem:[#allocation4 + $0xf4] sm:$0xf0]  ;;  %v3094_v12 = vld [vmem:[#allocation4 + $0x250] sm:$0xf0] }
  0x83   :  { %1621 = vmatpush.bf16.msra.mxu0 %v2905_v59  ;;  %v3758_v59 = vld [vmem:[#allocation4 + $0x144] sm:$0xf]  ;;  %v2925_v40 = vor.u32 %v3749_v35, %v2924_v34  ;;  %v3062_v35 = vld [vmem:[#allocation4 + $0x210] sm:$0xf0] }
  0x84   :  { %1595 = vmatpush.bf16.msra.mxu3 %v3157_v23  ;;  %v2969_v61 = vor.u32 %v3758_v59, %v2966_v60  ;;  %v3816_v59 = vld [vmem:[#allocation4 + $0x30c] sm:$0xf0]  ;;  %v3782_v34 = vld [vmem:[#allocation4 + $0x204] sm:$0xf] }
  0x86   :  { %1636 = vmatpush.bf16.msrb.mxu2 %v3001_v41  ;;  %v2908_v41 = vld [vmem:[#allocation4 + $0xc8] sm:$0xf] }
  0x87   :  { %1622 = vmatpush.bf16.msra.mxu0 %v2889_v62  ;;  %v3268_v62 = vld [vmem:[#allocation4 + $0x3a0] sm:$0xf]  ;;  %v2909_v54 = vor.u32 %v3745_v46, %v2908_v41  ;;  %v2828_v41 = vld [vmem:[#allocation4 + $0x28] sm:$0xf]  ;;  %v3826_v46 = vld [vmem:[#allocation4 + $0x364] sm:$0xf] }
  0x88   :  { %1596 = vmatpush.bf16.msra.mxu3 %v3141_v32  ;;  %v3269_v0 = vor.u32 %v3836_v63, %v3268_v62  ;;  %v3824_v32 = vld [vmem:[#allocation4 + $0x34c] sm:$0xf0]  ;;  %v3302_v62 = vld [vmem:[#allocation4 + $0x3f0] sm:$0xf0] }
  0x89   :  { %v3221_v36 = vor.u32 %v3824_v32, %v3220_v31  ;;  %v3254_v31 = vld [vmem:[#allocation4 + $0x390] sm:$0xf0] }
  0x8a   :  { %1637 = vmatpush.bf16.msrb.mxu2 %v2985_v52  ;;  %1609 = vmatpush.bf16.msrb.mxu1 %v3269_v0  ;;  %v3798_v52 = vld [vmem:[#allocation4 + $0x284] sm:$0xf] }
  0x8b   :  { %1623 = vmatpush.bf16.msra.mxu0 %v2873_v48  ;;  %v3076_v48 = vld [vmem:[#allocation4 + $0x220] sm:$0xf]  ;;  %v3129_v56 = vor.u32 %v3798_v52, %v3126_v53  ;;  %v3794_v0 = vld [vmem:[#allocation4 + $0x264] sm:$0xf] }
  0x8c   :  { %1597 = vmatpush.bf16.msra.mxu3 %v3125_v38  ;;  %v3802_v38 = vld [vmem:[#allocation4 + $0x2a4] sm:$0xf] }
  0x8d   :  { %v3145_v44 = vor.u32 %v3802_v38, %v3142_v39  ;;  %v3065_v38 = vor.u32 %v3782_v34, %v3062_v35  ;;  %v3731_v34 = vld [vmem:[#allocation4 + $0x6c] sm:$0xf]  ;;  %v2862_v35 = vld [vmem:[#allocation4 + $0x78] sm:$0xf0] }
  0x8e   :  { %1638 = vmatpush.bf16.msrb.mxu2 %v2969_v61  ;;  %v3842_v61 = vld [vmem:[#allocation4 + $0x3e4] sm:$0xf] }
  0x8f   :  { %1624 = vmatpush.bf16.msra.mxu0 %v2857_v3  ;;  %v3077_v3 = vor.u32 %v3788_v1, %v3076_v48  ;;  %v3305_v63 = vor.u32 %v3842_v61, %v3302_v62  ;;  %v3110_v48 = vld [vmem:[#allocation4 + $0x270] sm:$0xf0]  ;;  %v2893_v1 = vor.u32 %v3741_v57, %v2892_v55  ;;  %v3777_v55 = vld [vmem:[#allocation4 + $0x1d4] sm:$0xf0]  ;;  %v2812_v57 = vld [vmem:[#allocation4 + $0x8] sm:$0xf] }
  0x90   :  { %1598 = vmatpush.bf16.msra.mxu3 %v3109_v49  ;;  %v3204_v49 = vld [vmem:[#allocation4 + $0x320] sm:$0xf]  ;;  %v3822_v61 = vld [vmem:[#allocation4 + $0x344] sm:$0xf]  ;;  %v3222_v62 = vld [vmem:[#allocation4 + $0x350] sm:$0xf0] }
  0x91   :  { %v3205_v51 = vor.u32 %v3820_v50, %v3204_v49 }
  0x92   :  { %1639 = vmatpush.bf16.msrb.mxu2 %v2953_v7 }
  0x93   :  { %1625 = vmatpush.bf16.msra.mxu0 %v2841_v8  ;;  %v3832_v8 = vld [vmem:[#allocation4 + $0x38c] sm:$0xf0] }
  0x94   :  { %1599 = vmatpush.bf16.msra.mxu3 %v3093_v58  ;;  %v3253_v11 = vor.u32 %v3832_v8, %v3252_v10  ;;  %v3188_v58 = vld [vmem:[#allocation4 + $0x300] sm:$0xf]  ;;  %v3838_v10 = vld [vmem:[#allocation4 + $0x3c4] sm:$0xf]  ;;  %v3286_v8 = vld [vmem:[#allocation4 + $0x3d0] sm:$0xf0] }
  0x95   :  { %v3189_v60 = vor.u32 %v3816_v59, %v3188_v58  ;;  %v3721_v58 = vld [vmem:[#allocation4 + $0x14] sm:$0xf0]  ;;  %v3747_v59 = vld [vmem:[#allocation4 + $0xec] sm:$0xf] }
  0x96   :  { %1610 = vmatpush.bf16.msrb.mxu1 %v3253_v11  ;;  %v3790_v11 = vld [vmem:[#allocation4 + $0x244] sm:$0xf] }
  0x97   :  { %1626 = vmatpush.bf16.msra.mxu0 %v2825_v21  ;;  %v2937_v21 = vor.u32 %v3750_v18, %v2934_v19  ;;  %v3834_v18 = vld [vmem:[#allocation4 + $0x3a4] sm:$0xf]  ;;  %v3270_v19 = vld [vmem:[#allocation4 + $0x3b0] sm:$0xf0] }
  0x98   :  { %1600 = vmatpush.bf16.msra.mxu3 %v3077_v3  ;;  %v3113_v3 = vor.u32 %v3794_v0, %v3110_v48  ;;  %v2813_v48 = vor.u32 %v3721_v58, %v2812_v57  ;;  %v3054_v57 = vld [vmem:[#allocation4 + $0x1f8] sm:$0xf0] }
  0x99   :  { %1640 = vmatpush.bf16.msrb.mxu2 %v2937_v21  ;;  %v3786_v21 = vld [vmem:[#allocation4 + $0x224] sm:$0xf] }
  0x9a   :  { %1611 = vmatpush.bf16.msrb.mxu1 %v3237_v25 }
  0x9b   :  { %1627 = vmatpush.bf16.msra.mxu0 %v2809_v29  ;;  %v3158_v29 = vld [vmem:[#allocation4 + $0x2d0] sm:$0xf0] }
  0x9c   :  { %1601 = vmatpush.bf16.msra.mxu3 %v3061_v14  ;;  %v3161_v30 = vor.u32 %v3806_v28, %v3158_v29  ;;  %v3097_v14 = vor.u32 %v3790_v11, %v3094_v12 }
  0x9e   :  { %1612 = vmatpush.bf16.msrb.mxu1 %v3221_v36 }
  0xa0   :  { %1646 = vmatpush.bf16.msrb.mxu3 %v3177_v17  ;;  %v3733_v17 = vld [vmem:[#allocation4 + $0x74] sm:$0xf0] }
  0xa2   :  { %1613 = vmatpush.bf16.msrb.mxu1 %v3205_v51 }
  0xa4   :  { %1647 = vmatpush.bf16.msrb.mxu3 %v3161_v30  ;;  %v3830_v30 = vld [vmem:[#allocation4 + $0x384] sm:$0xf] }
  0xa6   :  { %1614 = vmatpush.bf16.msrb.mxu1 %v3189_v60  ;;  %v2926_v60 = vld [vmem:[#allocation4 + $0xf8] sm:$0xf0] }
  0xa8   :  { %1648 = vmatpush.bf16.msrb.mxu3 %v3145_v44 }
  0xaa   :  { %1659 = vmatpush.bf16.msra.mxu1 %v3305_v63  ;;  %v3225_v63 = vor.u32 %v3822_v61, %v3222_v62  ;;  %v187_v61 = vperm.slane %v4146_v2, 3 }
  0xac   :  { %1649 = vmatpush.bf16.msrb.mxu3 %v3129_v56 }
  0xae   :  { %v661_v4 = vpop.f32.mrf.mxu3 }
  0xb0   :  { %1650 = vmatpush.bf16.msrb.mxu3 %v3113_v3  ;;  %v3020_v3 = vld [vmem:[#allocation4 + $0x1a8] sm:$0xf] }
  0xb3   :  { %v635_v20 = vpop.f32.mrf.mxu0 }
  0xb4   :  { %v636_v23 = vadd.f32 %v635_v20, %v184_v9  ;;  %v3289_v9 = vor.u32 %v3838_v10, %v3286_v8  ;;  %1651 = vmatpush.bf16.msrb.mxu3 %v3097_v14  ;;  %v3273_v20 = vor.u32 %v3834_v18, %v3270_v19  ;;  %v3818_v8 = vld [vmem:[#allocation4 + $0x324] sm:$0xf]  ;;  %v3004_v14 = vld [vmem:[#allocation4 + $0x188] sm:$0xf]  ;;  %v3190_v19 = vld [vmem:[#allocation4 + $0x310] sm:$0xf0] }
  0xb5   :  { %v648_v24 = vpop.f32.mrf.mxu1  ;;  %v3814_v18 = vld [vmem:[#allocation4 + $0x304] sm:$0xf] }
  0xb6   :  { %v649_v26 = vadd.f32 %v648_v24, %v636_v23  ;;  %v663_v27 = vpop.f32.mrf.mxu3  ;;  %1660 = vmatpush.bf16.msra.mxu1 %v3289_v9  ;;  %v2861_v23 = vor.u32 %v3733_v17, %v2860_v16  ;;  %v3081_v24 = vor.u32 %v3786_v21, %v3078_v22  ;;  %v3206_v9 = vld [vmem:[#allocation4 + $0x330] sm:$0xf0]  ;;  %v3739_v16 = vld [vmem:[#allocation4 + $0xac] sm:$0xf]  ;;  %v2894_v17 = vld [vmem:[#allocation4 + $0xb8] sm:$0xf0] }
  0xb7   :  { %v3729_v27 = vld [vmem:[#allocation4 + $0x54] sm:$0xf0]  ;;  %v3209_v11 = vor.u32 %v3818_v8, %v3206_v9  ;;  %v2897_v22 = vor.u32 %v3739_v16, %v2894_v17  ;;  %v3719_v8 = vld [vmem:[#allocation4 + $0xc] sm:$0xf]  ;;  %v2814_v9 = vld [vmem:[#allocation4 + $0x18] sm:$0xf0] }
  0xb8   :  { %v662_v33 = vadd.f32 %v661_v4, %v649_v26  ;;  %v2876_v4 = vld [vmem:[#allocation4 + $0x88] sm:$0xf]  ;;  %1652 = vmatpush.bf16.msrb.mxu3 %v3081_v24  ;;  %v3771_v16 = vld [vmem:[#allocation4 + $0x1ac] sm:$0xf]  ;;  %v3022_v17 = vld [vmem:[#allocation4 + $0x1b8] sm:$0xf0] }
  0xb9   :  { %v2877_v13 = vor.u32 %v3737_v5, %v2876_v4  ;;  %v2844_v26 = vld [vmem:[#allocation4 + $0x48] sm:$0xf]  ;;  %v3773_v4 = vld [vmem:[#allocation4 + $0x1b4] sm:$0xf0]  ;;  %v3743_v5 = vld [vmem:[#allocation4 + $0xcc] sm:$0xf] }
  0xba   :  { %v782_v37 = vmax.f32 %v662_v33, 0.0  ;;  %1661 = vmatpush.bf16.msra.mxu1 %v3273_v20  ;;  %v3257_v33 = vor.u32 %v3830_v30, %v3254_v31  ;;  %v2845_v36 = vor.u32 %v3729_v27, %v2844_v26  ;;  %v3021_v12 = vor.u32 %v3773_v4, %v3020_v3  ;;  %v3735_v26 = vld [vmem:[#allocation4 + $0x8c] sm:$0xf]  ;;  %v2878_v27 = vld [vmem:[#allocation4 + $0x98] sm:$0xf0] }
  0xbb   :  { %v637_v42 = vpop.f32.mrf.mxu0  ;;  %v3193_v20 = vor.u32 %v3814_v18, %v3190_v19  ;;  %v2881_v30 = vor.u32 %v3735_v26, %v2878_v27  ;;  %v2972_v31 = vld [vmem:[#allocation4 + $0x148] sm:$0xf]  ;;  %v3809_v3 = vld [vmem:[#allocation4 + $0x2d4] sm:$0xf0] }
  0xbc   :  { %v4149_v45 = vpack.c.bf16 %v782_v37, %v782_v37  ;;  %v687_v7 = vpop.f32.mrf.mxu2  ;;  %v3052_v37 = vld [vmem:[#allocation4 + $0x1e8] sm:$0xf]  ;;  %v3725_v42 = vld [vmem:[#allocation4 + $0x34] sm:$0xf0]  ;;  %1653 = vmatpush.bf16.msrb.mxu3 %v3065_v38  ;;  %v2865_v38 = vor.u32 %v3731_v34, %v2862_v35  ;;  %v3763_v35 = vld [vmem:[#allocation4 + $0x16c] sm:$0xf] }
  0xbd   :  { %v650_v47 = vpop.f32.mrf.mxu1  ;;  %v2829_v52 = vor.u32 %v3725_v42, %v2828_v41  ;;  %v3727_v42 = vld [vmem:[#allocation4 + $0x4c] sm:$0xf] }
  0xbe   :  { %1576 = vmatmul.bf16.vlgmr.msrb.gmra.mxu0 %v4149_v45  ;;  %1662 = vmatpush.bf16.msra.mxu1 %v3257_v33  ;;  %v3238_v47 = vld [vmem:[#allocation4 + $0x370] sm:$0xf0] }
  0xbf   :  { %1672 = vmatpush.bf16.msrb.mxu0 %v2925_v40  ;;  %v3781_v40 = vld [vmem:[#allocation4 + $0x1f4] sm:$0xf0]  ;;  %v3241_v50 = vor.u32 %v3826_v46, %v3238_v47  ;;  %v2846_v46 = vld [vmem:[#allocation4 + $0x58] sm:$0xf0] }
  0xc0   :  { %v3053_v51 = vor.u32 %v3781_v40, %v3052_v37  ;;  %v3757_v40 = vld [vmem:[#allocation4 + $0x134] sm:$0xf0] }
  0xc2   :  { %1663 = vmatpush.bf16.msra.mxu1 %v3241_v50 }
  0xc3   :  { %1673 = vmatpush.bf16.msrb.mxu0 %v2909_v54  ;;  %v3036_v54 = vld [vmem:[#allocation4 + $0x1c8] sm:$0xf] }
  0xc4   :  { %v689_v29 = vpop.f32.mrf.mxu2  ;;  %v3037_v0 = vor.u32 %v3777_v55, %v3036_v54  ;;  %v3753_v54 = vld [vmem:[#allocation4 + $0x114] sm:$0xf0]  ;;  %v3779_v55 = vld [vmem:[#allocation4 + $0x1ec] sm:$0xf] }
  0xc6   :  { %1664 = vmatpush.bf16.msra.mxu1 %v3225_v63 }
  0xc7   :  { %v700_v6 = vpop.f32.mrf.mxu0  ;;  %1674 = vmatpush.bf16.msrb.mxu0 %v2893_v1  ;;  %v2929_v1 = vor.u32 %v3747_v59, %v2926_v60  ;;  %v3723_v59 = vld [vmem:[#allocation4 + $0x2c] sm:$0xf]  ;;  %v2830_v60 = vld [vmem:[#allocation4 + $0x38] sm:$0xf0] }
  0xca   :  { %1665 = vmatpush.bf16.msra.mxu1 %v3209_v11 }
  0xcb   :  { %1675 = vmatpush.bf16.msrb.mxu0 %v2877_v13 }
  0xce   :  { %v674_v43 = vpop.f32.mrf.mxu3  ;;  %1628 = vmatmul.bf16.vlgmr.msra.gmra.mxu0 %v4149_v45  ;;  %1666 = vmatpush.bf16.msra.mxu1 %v3193_v20 }
  0xcf   :  { %v675_v25 = vadd.f32 %v674_v43, %v185_v15  ;;  %v702_v28 = vpop.f32.mrf.mxu0  ;;  %1676 = vmatpush.bf16.msrb.mxu0 %v2861_v23  ;;  %v3769_v15 = vld [vmem:[#allocation4 + $0x194] sm:$0xf0]  ;;  %v2988_v43 = vld [vmem:[#allocation4 + $0x168] sm:$0xf] }
  0xd0   :  { %v3005_v21 = vor.u32 %v3769_v15, %v3004_v14  ;;  %v3765_v23 = vld [vmem:[#allocation4 + $0x174] sm:$0xf0]  ;;  %v2817_v15 = vor.u32 %v3719_v8, %v2814_v9  ;;  %v3244_v8 = vld [vmem:[#allocation4 + $0x368] sm:$0xf] }
  0xd1   :  { %v688_v32 = vadd.f32 %v687_v7, %v675_v25  ;;  %v2910_v7 = vld [vmem:[#allocation4 + $0xd8] sm:$0xf0]  ;;  %v186_v25 = vperm.slane %v4146_v2, 2  ;;  %v2989_v29 = vor.u32 %v3765_v23, %v2988_v43  ;;  %v3025_v43 = vor.u32 %v3771_v16, %v3022_v17  ;;  %v3829_v9 = vld [vmem:[#allocation4 + $0x374] sm:$0xf0] }
  0xd2   :  { %v2913_v13 = vor.u32 %v3743_v5, %v2910_v7  ;;  %v3057_v5 = vor.u32 %v3779_v55, %v3054_v57  ;;  %v3775_v7 = vld [vmem:[#allocation4 + $0x1cc] sm:$0xf]  ;;  %v3825_v16 = vld [vmem:[#allocation4 + $0x354] sm:$0xf0] }
  0xd3   :  { %v701_v39 = vadd.f32 %v700_v6, %v688_v32  ;;  %1677 = vmatpush.bf16.msrb.mxu0 %v2845_v36  ;;  %v3761_v32 = vld [vmem:[#allocation4 + $0x154] sm:$0xf0] }
  0xd4   :  { %v2973_v36 = vor.u32 %v3761_v32, %v2972_v31  ;;  %v3797_v31 = vld [vmem:[#allocation4 + $0x274] sm:$0xf0] }
  0xd5   :  { %v4154_v44 = vpop.f32.mrf.mxu1  ;;  %v783_v49 = vmax.f32 %v701_v39, 0.0  ;;  %v2956_v39 = vld [vmem:[#allocation4 + $0x128] sm:$0xf] }
  0xd6   :  { %v676_v53 = vpop.f32.mrf.mxu3  ;;  %v714_v33 = vadd.f32 %v4154_v44, %v186_v25  ;;  %v2957_v50 = vor.u32 %v3757_v40, %v2956_v39  ;;  %v3813_v44 = vld [vmem:[#allocation4 + $0x2f4] sm:$0xf0]  ;;  %v3006_v25 = vld [vmem:[#allocation4 + $0x198] sm:$0xf0]  ;;  %v3292_v39 = vld [vmem:[#allocation4 + $0x3c8] sm:$0xf] }
  0xd7   :  { %v4156_v56 = vpack.c.bf16 %v783_v49, %v783_v49  ;;  %1678 = vmatpush.bf16.msrb.mxu0 %v2829_v52  ;;  %v2940_v52 = vld [vmem:[#allocation4 + $0x108] sm:$0xf]  ;;  %v2849_v53 = vor.u32 %v3727_v42, %v2846_v46  ;;  %v3841_v40 = vld [vmem:[#allocation4 + $0x3d4] sm:$0xf0] }
  0xd8   :  { %v3793_v42 = vld [vmem:[#allocation4 + $0x254] sm:$0xf0] }
  0xd9   :  { %1589 = vmatmul.bf16.vlgmr.msra.gmra.mxu2 %v4156_v56 }
  0xda   :  { %1685 = vmatpush.bf16.msra.mxu2 %v3053_v51  ;;  %v3180_v51 = vld [vmem:[#allocation4 + $0x2e8] sm:$0xf] }
  0xdb   :  { %v739_v6 = vpop.f32.mrf.mxu0  ;;  %1679 = vmatpush.bf16.msrb.mxu0 %v2813_v48  ;;  %v3181_v63 = vor.u32 %v3813_v44, %v3180_v51  ;;  %v2941_v48 = vor.u32 %v3753_v54, %v2940_v52  ;;  %v3276_v44 = vld [vmem:[#allocation4 + $0x3a8] sm:$0xf]  ;;  %v3837_v52 = vld [vmem:[#allocation4 + $0x3b4] sm:$0xf0] }
  0xdc   :  { %v752_v28 = vpop.f32.mrf.mxu2  ;;  %v3789_v54 = vld [vmem:[#allocation4 + $0x234] sm:$0xf0]  ;;  %v3277_v57 = vor.u32 %v3837_v52, %v3276_v44  ;;  %v3262_v44 = vld [vmem:[#allocation4 + $0x398] sm:$0xf0]  ;;  %v3783_v52 = vld [vmem:[#allocation4 + $0x20c] sm:$0xf] }
  0xdd   :  { %v715_v10 = vpop.f32.mrf.mxu1  ;;  %v753_v11 = vadd.f32 %v752_v28, %v187_v61  ;;  %v3308_v28 = vld [vmem:[#allocation4 + $0x3e8] sm:$0xf] }
  0xde   :  { %1686 = vmatpush.bf16.msra.mxu2 %v3037_v0  ;;  %1680 = vmatmul.bf16.vlgmr.msrb.gmra.mxu0 %v4149_v45  ;;  %v3038_v10 = vld [vmem:[#allocation4 + $0x1d8] sm:$0xf0]  ;;  %v3260_v61 = vld [vmem:[#allocation4 + $0x388] sm:$0xf] }
  0xdf   :  { %1724 = vmatpush.bf16.msra.mxu0 %v2929_v1  ;;  %v3164_v1 = vld [vmem:[#allocation4 + $0x2c8] sm:$0xf]  ;;  %v3041_v14 = vor.u32 %v3775_v7, %v3038_v10  ;;  %v2942_v7 = vld [vmem:[#allocation4 + $0x118] sm:$0xf0] }
  0xe0   :  { %v3165_v2 = vor.u32 %v3809_v3, %v3164_v1  ;;  %v3811_v3 = vld [vmem:[#allocation4 + $0x2ec] sm:$0xf] }
  0xe2   :  { %1687 = vmatpush.bf16.msra.mxu2 %v3021_v12  ;;  %v3148_v12 = vld [vmem:[#allocation4 + $0x2a8] sm:$0xf] }
  0xe3   :  { %1725 = vmatpush.bf16.msra.mxu0 %v2913_v13  ;;  %v741_v24 = vpop.f32.mrf.mxu0  ;;  %v3805_v13 = vld [vmem:[#allocation4 + $0x2b4] sm:$0xf0] }
  0xe4   :  { %v754_v47 = vpop.f32.mrf.mxu2  ;;  %v3149_v20 = vor.u32 %v3805_v13, %v3148_v12  ;;  %v3767_v24 = vld [vmem:[#allocation4 + $0x18c] sm:$0xf]  ;;  %v3166_v13 = vld [vmem:[#allocation4 + $0x2d8] sm:$0xf0] }
  0xe5   :  { %v3293_v47 = vor.u32 %v3841_v40, %v3292_v39  ;;  %v3807_v12 = vld [vmem:[#allocation4 + $0x2cc] sm:$0xf]  ;;  %v3102_v39 = vld [vmem:[#allocation4 + $0x258] sm:$0xf0] }
  0xe6   :  { %1688 = vmatpush.bf16.msra.mxu2 %v3005_v21  ;;  %v3132_v21 = vld [vmem:[#allocation4 + $0x288] sm:$0xf]  ;;  %v3169_v17 = vor.u32 %v3807_v12, %v3166_v13  ;;  %v3857_v12 = vld [vmem:[#allocation6 + $0x54] sm:$0xf0] }
  0xe7   :  { %1726 = vmatpush.bf16.msra.mxu0 %v2897_v22  ;;  %v3801_v22 = vld [vmem:[#allocation4 + $0x294] sm:$0xf0] }
  0xe8   :  { %v3133_v27 = vor.u32 %v3801_v22, %v3132_v21  ;;  %v3212_v21 = vld [vmem:[#allocation4 + $0x328] sm:$0xf]  ;;  %v3821_v22 = vld [vmem:[#allocation4 + $0x334] sm:$0xf0] }
  0xe9   :  { %1641 = vmatmul.bf16.vlgmr.msrb.gmra.mxu2 %v4156_v56 }
  0xea   :  { %1689 = vmatpush.bf16.msra.mxu2 %v2989_v29  ;;  %v3845_v29 = vld [vmem:[#allocation4 + $0x3f4] sm:$0xf0] }
  0xeb   :  { %1727 = vmatpush.bf16.msra.mxu0 %v2881_v30  ;;  %v3116_v30 = vld [vmem:[#allocation4 + $0x268] sm:$0xf]  ;;  %v3309_v34 = vor.u32 %v3845_v29, %v3308_v28  ;;  %v3843_v29 = vld [vmem:[#allocation4 + $0x3ec] sm:$0xf] }
  0xee   :  { %v726_v37 = vpop.f32.mrf.mxu3  ;;  %1690 = vmatpush.bf16.msra.mxu2 %v2973_v36  ;;  %v2990_v36 = vld [vmem:[#allocation4 + $0x178] sm:$0xf0] }
  0xef   :  { %v727_v41 = vadd.f32 %v726_v37, %v714_v33  ;;  %1728 = vmatpush.bf16.msra.mxu0 %v2865_v38  ;;  %v3009_v33 = vor.u32 %v3767_v24, %v3006_v25  ;;  %v3117_v38 = vor.u32 %v3797_v31, %v3116_v30  ;;  %v3134_v24 = vld [vmem:[#allocation4 + $0x298] sm:$0xf0]  ;;  %v3213_v25 = vor.u32 %v3821_v22, %v3212_v21  ;;  %v3795_v31 = vld [vmem:[#allocation4 + $0x26c] sm:$0xf]  ;;  %v3877_v21 = vld [vmem:[#allocation6 + $0xf4] sm:$0xf0] }
  0xf0   :  { %v3310_v30 = vld [vmem:[#allocation4 + $0x3f8] sm:$0xf0] }
  0xf1   :  { %v740_v49 = vadd.f32 %v739_v6, %v727_v41  ;;  %v2833_v6 = vor.u32 %v3723_v59, %v2830_v60  ;;  %v3100_v41 = vld [vmem:[#allocation4 + $0x248] sm:$0xf]  ;;  %v2958_v59 = vld [vmem:[#allocation4 + $0x138] sm:$0xf0] }
  0xf2   :  { %1691 = vmatpush.bf16.msra.mxu2 %v2957_v50  ;;  %v2974_v50 = vld [vmem:[#allocation4 + $0x158] sm:$0xf0]  ;;  %v3101_v51 = vor.u32 %v3793_v42, %v3100_v41  ;;  %v3835_v42 = vld [vmem:[#allocation4 + $0x3ac] sm:$0xf] }
  0xf3   :  { %v784_v58 = vmax.f32 %v740_v49, 0.0  ;;  %1729 = vmatpush.bf16.msra.mxu0 %v2849_v53  ;;  %v3759_v49 = vld [vmem:[#allocation4 + $0x14c] sm:$0xf]  ;;  %v3084_v53 = vld [vmem:[#allocation4 + $0x228] sm:$0xf] }
  0xf4   :  { %v2977_v55 = vor.u32 %v3759_v49, %v2974_v50  ;;  %v3085_v60 = vor.u32 %v3789_v54, %v3084_v53  ;;  %v3070_v53 = vld [vmem:[#allocation4 + $0x218] sm:$0xf0] }
  0xf5   :  { %v765_v62 = vpop.f32.mrf.mxu1  ;;  %v4164_v0 = vpack.c.bf16 %v784_v58, %v784_v58  ;;  %v3755_v58 = vld [vmem:[#allocation4 + $0x12c] sm:$0xf] }
  0xf6   :  { %v728_v4 = vpop.f32.mrf.mxu3  ;;  %1692 = vmatpush.bf16.msra.mxu2 %v2941_v48  ;;  %v766_v18 = vadd.f32 %v765_v62, %v753_v11  ;;  %v3833_v62 = vld [vmem:[#allocation4 + $0x394] sm:$0xf0]  ;;  %v2961_v1 = vor.u32 %v3755_v58, %v2958_v59  ;;  %v3246_v58 = vld [vmem:[#allocation4 + $0x378] sm:$0xf0] }
  0xf7   :  { %1602 = vmatmul.bf16.vlgmr.msra.gmra.mxu3 %v4164_v0  ;;  %1730 = vmatpush.bf16.msra.mxu0 %v2833_v6  ;;  %v3785_v48 = vld [vmem:[#allocation4 + $0x214] sm:$0xf0]  ;;  %v3182_v4 = vld [vmem:[#allocation4 + $0x2f8] sm:$0xf0]  ;;  %v3751_v6 = vld [vmem:[#allocation4 + $0x10c] sm:$0xf] }
  0xf8   :  { %1698 = vmatpush.bf16.msra.mxu3 %v3181_v63  ;;  %v3068_v63 = vld [vmem:[#allocation4 + $0x208] sm:$0xf]  ;;  %v3185_v11 = vor.u32 %v3811_v3, %v3182_v4  ;;  %v3815_v3 = vld [vmem:[#allocation4 + $0x30c] sm:$0xf]  ;;  %v3198_v4 = vld [vmem:[#allocation4 + $0x318] sm:$0xf0] }
  0xf9   :  { %1693 = vmatmul.bf16.vlgmr.msra.gmra.mxu2 %v4156_v56  ;;  %v3069_v10 = vor.u32 %v3785_v48, %v3068_v63  ;;  %v3819_v63 = vld [vmem:[#allocation4 + $0x32c] sm:$0xf]  ;;  %v3214_v48 = vld [vmem:[#allocation4 + $0x338] sm:$0xf0] }
  0xfa   :  { %1737 = vmatpush.bf16.msrb.mxu2 %v3057_v5  ;;  %v3261_v5 = vor.u32 %v3833_v62, %v3260_v61  ;;  %v3230_v61 = vld [vmem:[#allocation4 + $0x358] sm:$0xf0] }
  0xfb   :  { %1731 = vmatpush.bf16.msra.mxu0 %v2817_v15  ;;  %v3228_v15 = vld [vmem:[#allocation4 + $0x348] sm:$0xf] }
  0xfc   :  { %1699 = vmatpush.bf16.msra.mxu3 %v3165_v2  ;;  %v2945_v2 = vor.u32 %v3751_v6, %v2942_v7  ;;  %v3861_v6 = vld [vmem:[#allocation6 + $0x74] sm:$0xf0] }
  0xfd   :  { %v767_v19 = vpop.f32.mrf.mxu1 }
  0xfe   :  { %1738 = vmatpush.bf16.msrb.mxu2 %v3041_v14  ;;  %1732 = vmatmul.bf16.vlgmr.msra.gmra.mxu0 %v4149_v45  ;;  %v2993_v45 = vor.u32 %v3763_v35, %v2990_v36  ;;  %v3245_v14 = vor.u32 %v3829_v9, %v3244_v8  ;;  %v3150_v19 = vld [vmem:[#allocation4 + $0x2b8] sm:$0xf0]  ;;  %v3364_v8 = vld [vmem:[#allocation6 + $0x60] sm:$0xf]  ;;  %v3859_v9 = vld [vmem:[#allocation6 + $0x64] sm:$0xf0] }
  0xff   :  { %v3294_v36 = vld [vmem:[#allocation4 + $0x3d8] sm:$0xf0] }
 0x100   :  { %1700 = vmatpush.bf16.msra.mxu3 %v3149_v20  ;;  %v3229_v20 = vor.u32 %v3825_v16, %v3228_v15  ;;  %v3855_v15 = vld [vmem:[#allocation6 + $0x44] sm:$0xf0] }
 0x102   :  { %v778_v23 = vpop.f32.mrf.mxu3  ;;  %1739 = vmatpush.bf16.msrb.mxu2 %v3025_v43 }
 0x103   :  { %v779_v26 = vadd.f32 %v778_v23, %v766_v18  ;;  %v3803_v18 = vld [vmem:[#allocation4 + $0x2ac] sm:$0xf] }
 0x104   :  { %1701 = vmatpush.bf16.msra.mxu3 %v3133_v27  ;;  %v3153_v43 = vor.u32 %v3803_v18, %v3150_v19  ;;  %v3799_v23 = vld [vmem:[#allocation4 + $0x28c] sm:$0xf]  ;;  %v3817_v27 = vld [vmem:[#allocation4 + $0x314] sm:$0xf0]  ;;  %v3340_v18 = vld [vmem:[#allocation6 + $0x30] sm:$0xf] }
 0x105   :  { %v785_v32 = vmax.f32 %v779_v26, 0.0  ;;  %v3196_v26 = vld [vmem:[#allocation4 + $0x308] sm:$0xf]  ;;  %v3137_v28 = vor.u32 %v3799_v23, %v3134_v24  ;;  %v3853_v19 = vld [vmem:[#allocation6 + $0x34] sm:$0xf0] }
 0x106   :  { %1740 = vmatpush.bf16.msrb.mxu2 %v3009_v33  ;;  %v3197_v33 = vor.u32 %v3817_v27, %v3196_v26  ;;  %v3341_v22 = vor.u32 %v3853_v19, %v3340_v18  ;;  %v3332_v23 = vld [vmem:[#allocation6 + $0x20] sm:$0xf]  ;;  %v3851_v24 = vld [vmem:[#allocation6 + $0x24] sm:$0xf0] }
 0x107   :  { %v4169_v37 = vpack.c.bf16 %v785_v32, %v785_v32  ;;  %1654 = vmatmul.bf16.vlgmr.msrb.gmra.mxu3 %v4164_v0  ;;  %v3118_v32 = vld [vmem:[#allocation4 + $0x278] sm:$0xf0]  ;;  %v3333_v26 = vor.u32 %v3851_v24, %v3332_v23  ;;  %v3875_v27 = vld [vmem:[#allocation6 + $0xe4] sm:$0xf0]  ;;  %v3876_v23 = vld [vmem:[#allocation6 + $0xf4] sm:$0xf] }
 0x108   :  { %1702 = vmatpush.bf16.msra.mxu3 %v3117_v38  ;;  %v3121_v35 = vor.u32 %v3795_v31, %v3118_v32  ;;  %v3791_v38 = vld [vmem:[#allocation4 + $0x24c] sm:$0xf]  ;;  %v3420_v31 = vld [vmem:[#allocation6 + $0xd0] sm:$0xf]  ;;  %v3873_v32 = vld [vmem:[#allocation6 + $0xd4] sm:$0xf0] }
 0x109   :  { %1615 = vmatmul.bf16.vlgmr.msrb.gmra.mxu1 %v4169_v37  ;;  %v3105_v41 = vor.u32 %v3791_v38, %v3102_v39  ;;  %v3887_v19 = vld [vmem:[#allocation6 + $0x144] sm:$0xf0]  ;;  %v3438_v24 = vld [vmem:[#allocation6 + $0xf8] sm:$0xf0] }
 0x10a   :  { %1711 = vmatpush.bf16.msrb.mxu1 %v3309_v34  ;;  %v780_v46 = vpop.f32.mrf.mxu3  ;;  %1741 = vmatpush.bf16.msrb.mxu2 %v2993_v45  ;;  %v3313_v34 = vor.u32 %v3843_v29, %v3310_v30  ;;  %v3278_v45 = vld [vmem:[#allocation4 + $0x3b8] sm:$0xf0]  ;;  %v3849_v29 = vld [vmem:[#allocation6 + $0x14] sm:$0xf0] }
 0x10b   :  { %v3787_v46 = vld [vmem:[#allocation4 + $0x22c] sm:$0xf]  ;;  %v3281_v49 = vor.u32 %v3835_v42, %v3278_v45  ;;  %v3374_v42 = vld [vmem:[#allocation6 + $0x78] sm:$0xf0] }
 0x10c   :  { %1703 = vmatpush.bf16.msra.mxu3 %v3101_v51  ;;  %v3831_v51 = vld [vmem:[#allocation4 + $0x38c] sm:$0xf] }
 0x10d   :  { %v3265_v54 = vor.u32 %v3831_v51, %v3262_v44  ;;  %v3893_v44 = vld [vmem:[#allocation6 + $0x174] sm:$0xf0] }
 0x10e   :  { %1712 = vmatpush.bf16.msrb.mxu1 %v3293_v47  ;;  %1742 = vmatpush.bf16.msrb.mxu2 %v2977_v55  ;;  %v3086_v47 = vld [vmem:[#allocation4 + $0x238] sm:$0xf0]  ;;  %v3073_v55 = vor.u32 %v3783_v52, %v3070_v53  ;;  %v3858_v52 = vld [vmem:[#allocation6 + $0x64] sm:$0xf]  ;;  %v3366_v53 = vld [vmem:[#allocation6 + $0x68] sm:$0xf0] }
 0x10f   :  { %v3089_v50 = vor.u32 %v3787_v46, %v3086_v47  ;;  %v3404_v47 = vld [vmem:[#allocation6 + $0xb0] sm:$0xf] }
 0x110   :  { %1704 = vmatpush.bf16.msra.mxu3 %v3085_v60  ;;  %v3823_v60 = vld [vmem:[#allocation4 + $0x34c] sm:$0xf] }
 0x111   :  { %v3233_v62 = vor.u32 %v3823_v60, %v3230_v61  ;;  %v3492_v60 = vld [vmem:[#allocation6 + $0x160] sm:$0xf] }
 0x112   :  { %1713 = vmatpush.bf16.msrb.mxu1 %v3277_v57  ;;  %1743 = vmatpush.bf16.msrb.mxu2 %v2961_v1  ;;  %v3827_v57 = vld [vmem:[#allocation4 + $0x36c] sm:$0xf]  ;;  %v3217_v1 = vor.u32 %v3819_v63, %v3214_v48  ;;  %v3891_v63 = vld [vmem:[#allocation6 + $0x164] sm:$0xf0]  ;;  %v3856_v48 = vld [vmem:[#allocation6 + $0x54] sm:$0xf] }
 0x113   :  { %v3249_v59 = vor.u32 %v3827_v57, %v3246_v58  ;;  %v3396_v58 = vld [vmem:[#allocation6 + $0xa0] sm:$0xf] }
 0x114   :  { %1705 = vmatpush.bf16.msra.mxu3 %v3069_v10  ;;  %v3201_v10 = vor.u32 %v3815_v3, %v3198_v4  ;;  %v3493_v3 = vor.u32 %v3891_v63, %v3492_v60  ;;  %v3444_v60 = vld [vmem:[#allocation6 + $0x100] sm:$0xf]  ;;  %v3564_v63 = vld [vmem:[#allocation6 + $0x1f0] sm:$0xf] }
 0x116   :  { %1714 = vmatpush.bf16.msrb.mxu1 %v3261_v5  ;;  %1744 = vmatpush.bf16.msrb.mxu2 %v2945_v2  ;;  %v3372_v5 = vld [vmem:[#allocation6 + $0x70] sm:$0xf] }
 0x117   :  { %1706 = vmatmul.bf16.vlgmr.msra.gmra.mxu3 %v4164_v0  ;;  %v3373_v7 = vor.u32 %v3861_v6, %v3372_v5  ;;  %v3356_v2 = vld [vmem:[#allocation6 + $0x50] sm:$0xf]  ;;  %v3865_v6 = vld [vmem:[#allocation6 + $0x94] sm:$0xf0] }
 0x118   :  { %1750 = vmatpush.bf16.msrb.mxu3 %v3185_v11  ;;  %v3357_v13 = vor.u32 %v3857_v12, %v3356_v2  ;;  %v3388_v5 = vld [vmem:[#allocation6 + $0x90] sm:$0xf] }
 0x119   :  { %1667 = vmatmul.bf16.vlgmr.msra.gmra.mxu1 %v4169_v37  ;;  %1745 = vmatmul.bf16.vlgmr.msrb.gmra.mxu2 %v4156_v56  ;;  %v3839_v56 = vld [vmem:[#allocation4 + $0x3cc] sm:$0xf] }
 0x11a   :  { %1715 = vmatpush.bf16.msrb.mxu1 %v3245_v14  ;;  %v3297_v40 = vor.u32 %v3839_v56, %v3294_v36  ;;  %2174 = vmatpush.bf16.msrb.mxu0 %v3373_v7  ;;  %v3348_v14 = vld [vmem:[#allocation6 + $0x40] sm:$0xf]  ;;  %v3847_v56 = vld [vmem:[#allocation6 + $0x4] sm:$0xf0]  ;;  %v3484_v7 = vld [vmem:[#allocation6 + $0x150] sm:$0xf] }
 0x11b   :  { %v3412_v36 = vld [vmem:[#allocation6 + $0xc0] sm:$0xf] }
 0x11c   :  { %1751 = vmatpush.bf16.msrb.mxu3 %v3169_v17  ;;  %v3349_v17 = vor.u32 %v3855_v15, %v3348_v14  ;;  %v3380_v14 = vld [vmem:[#allocation6 + $0x80] sm:$0xf]  ;;  %v3863_v15 = vld [vmem:[#allocation6 + $0x84] sm:$0xf0] }
 0x11d   :  { %v3381_v18 = vor.u32 %v3863_v15, %v3380_v14  ;;  %v3866_v14 = vld [vmem:[#allocation6 + $0xa4] sm:$0xf]  ;;  %v3398_v15 = vld [vmem:[#allocation6 + $0xa8] sm:$0xf0] }
 0x11e   :  { %1716 = vmatpush.bf16.msrb.mxu1 %v3229_v20  ;;  %v3436_v20 = vld [vmem:[#allocation6 + $0xf0] sm:$0xf] }
 0x120   :  { %1752 = vmatpush.bf16.msrb.mxu3 %v3153_v43  ;;  %v3437_v43 = vor.u32 %v3877_v21, %v3436_v20  ;;  %v3852_v20 = vld [vmem:[#allocation6 + $0x34] sm:$0xf]  ;;  %v3342_v21 = vld [vmem:[#allocation6 + $0x38] sm:$0xf0] }
 0x122   :  { %1717 = vmatpush.bf16.msrb.mxu1 %v3213_v25  ;;  %2187 = vmatpush.bf16.msra.mxu2 %v3437_v43  ;;  %v3428_v25 = vld [vmem:[#allocation6 + $0xe0] sm:$0xf]  ;;  %v3345_v43 = vor.u32 %v3852_v20, %v3342_v21  ;;  %v3494_v20 = vld [vmem:[#allocation6 + $0x168] sm:$0xf0] }
 0x123   :  { %v3429_v30 = vor.u32 %v3875_v27, %v3428_v25  ;;  %v3441_v25 = vor.u32 %v3876_v23, %v3438_v24  ;;  %v3885_v27 = vld [vmem:[#allocation6 + $0x134] sm:$0xf0]  ;;  %v3548_v23 = vld [vmem:[#allocation6 + $0x1d0] sm:$0xf] }
 0x124   :  { %1753 = vmatpush.bf16.msrb.mxu3 %v3137_v28  ;;  %v3324_v28 = vld [vmem:[#allocation6 + $0x10] sm:$0xf]  ;;  %v3905_v24 = vld [vmem:[#allocation6 + $0x1d4] sm:$0xf0] }
 0x126   :  { %1718 = vmatpush.bf16.msrb.mxu1 %v3197_v33  ;;  %v3325_v33 = vor.u32 %v3849_v29, %v3324_v28  ;;  %2188 = vmatpush.bf16.msra.mxu2 %v3429_v30  ;;  %v3850_v28 = vld [vmem:[#allocation6 + $0x24] sm:$0xf]  ;;  %v3334_v30 = vld [vmem:[#allocation6 + $0x28] sm:$0xf0] }
 0x128   :  { %1754 = vmatpush.bf16.msrb.mxu3 %v3121_v35  ;;  %v3316_v35 = vld [vmem:[#allocation6] sm:$0xf] }
 0x129   :  { %1719 = vmatmul.bf16.vlgmr.msrb.gmra.mxu1 %v4169_v37  ;;  %v3317_v39 = vor.u32 %v3847_v56, %v3316_v35  ;;  %v3460_v56 = vld [vmem:[#allocation6 + $0x120] sm:$0xf] }
 0x12a   :  { %1763 = vmatpush.bf16.msra.mxu1 %v3313_v34  ;;  %v3421_v34 = vor.u32 %v3873_v32, %v3420_v31  ;;  %v3874_v31 = vld [vmem:[#allocation6 + $0xe4] sm:$0xf]  ;;  %v3430_v32 = vld [vmem:[#allocation6 + $0xe8] sm:$0xf0] }
 0x12c   :  { %1755 = vmatpush.bf16.msrb.mxu3 %v3105_v41  ;;  %2189 = vmatpush.bf16.msra.mxu2 %v3421_v34  ;;  %v3860_v41 = vld [vmem:[#allocation6 + $0x74] sm:$0xf]  ;;  %v3433_v34 = vor.u32 %v3874_v31, %v3430_v32  ;;  %v3486_v31 = vld [vmem:[#allocation6 + $0x158] sm:$0xf0] }
 0x12d   :  { %v3377_v46 = vor.u32 %v3860_v41, %v3374_v42  ;;  %v3872_v41 = vld [vmem:[#allocation6 + $0xd4] sm:$0xf] }
 0x12e   :  { %1764 = vmatpush.bf16.msra.mxu1 %v3297_v40  ;;  %v3871_v40 = vld [vmem:[#allocation6 + $0xc4] sm:$0xf0] }
 0x12f   :  { %v3413_v45 = vor.u32 %v3871_v40, %v3412_v36  ;;  %v3883_v36 = vld [vmem:[#allocation6 + $0x124] sm:$0xf0]  ;;  %v3326_v40 = vld [vmem:[#allocation6 + $0x18] sm:$0xf0] }
 0x130   :  { %1756 = vmatpush.bf16.msrb.mxu3 %v3089_v50  ;;  %v3500_v50 = vld [vmem:[#allocation6 + $0x170] sm:$0xf] }
 0x131   :  { %2190 = vmatpush.bf16.msra.mxu2 %v3413_v45  ;;  %v3422_v45 = vld [vmem:[#allocation6 + $0xd8] sm:$0xf0] }
 0x132   :  { %1765 = vmatpush.bf16.msra.mxu1 %v3281_v49  ;;  %v3869_v49 = vld [vmem:[#allocation6 + $0xb4] sm:$0xf0] }
 0x133   :  { %v3405_v51 = vor.u32 %v3869_v49, %v3404_v47  ;;  %v3452_v47 = vld [vmem:[#allocation6 + $0x110] sm:$0xf]  ;;  %v3881_v49 = vld [vmem:[#allocation6 + $0x114] sm:$0xf0] }
 0x134   :  { %1757 = vmatpush.bf16.msrb.mxu3 %v3073_v55  ;;  %v3369_v55 = vor.u32 %v3858_v52, %v3366_v53  ;;  %v3870_v52 = vld [vmem:[#allocation6 + $0xc4] sm:$0xf] }
 0x135   :  { %2191 = vmatpush.bf16.msra.mxu2 %v3405_v51  ;;  %v3846_v51 = vld [vmem:[#allocation6 + $0x4] sm:$0xf] }
 0x136   :  { %1766 = vmatpush.bf16.msra.mxu1 %v3265_v54  ;;  %v3501_v54 = vor.u32 %v3893_v44, %v3500_v50  ;;  %v3453_v50 = vor.u32 %v3881_v49, %v3452_v47  ;;  %v3318_v44 = vld [vmem:[#allocation6 + $0x8] sm:$0xf0] }
 0x137   :  { %1758 = vmatmul.bf16.vlgmr.msrb.gmra.mxu3 %v4164_v0  ;;  %v3365_v0 = vor.u32 %v3859_v9, %v3364_v8  ;;  %v3889_v8 = vld [vmem:[#allocation6 + $0x154] sm:$0xf0]  ;;  %v3854_v9 = vld [vmem:[#allocation6 + $0x44] sm:$0xf]  ;;  %v3321_v53 = vor.u32 %v3846_v51, %v3318_v44  ;;  %v3532_v51 = vld [vmem:[#allocation6 + $0x1b0] sm:$0xf] }
 0x138   :  { %2200 = vmatpush.bf16.msra.mxu3 %v3501_v54  ;;  %v3485_v2 = vor.u32 %v3889_v8, %v3484_v7  ;;  %v3414_v54 = vld [vmem:[#allocation6 + $0xc8] sm:$0xf0]  ;;  %v3892_v8 = vld [vmem:[#allocation6 + $0x174] sm:$0xf]  ;;  %v3901_v44 = vld [vmem:[#allocation6 + $0x1b4] sm:$0xf0] }
 0x139   :  { %2175 = vmatpush.bf16.msrb.mxu0 %v3365_v0  ;;  %v3350_v0 = vld [vmem:[#allocation6 + $0x48] sm:$0xf0] }
 0x13a   :  { %1767 = vmatpush.bf16.msra.mxu1 %v3249_v59  ;;  %v3867_v59 = vld [vmem:[#allocation6 + $0xa4] sm:$0xf0]  ;;  %v3353_v12 = vor.u32 %v3854_v9, %v3350_v0  ;;  %v3502_v9 = vld [vmem:[#allocation6 + $0x178] sm:$0xf0] }
 0x13b   :  { %v4178_v11 = vpop.f32.mrf.mxu0  ;;  %v3505_v0 = vor.u32 %v3892_v8, %v3502_v9  ;;  %v3880_v8 = vld [vmem:[#allocation6 + $0x114] sm:$0xf]  ;;  %v3454_v9 = vld [vmem:[#allocation6 + $0x118] sm:$0xf0] }
 0x13c   :  { %2201 = vmatpush.bf16.msra.mxu3 %v3493_v3  ;;  %v3868_v3 = vld [vmem:[#allocation6 + $0xb4] sm:$0xf] }
 0x13d   :  { %2176 = vmatpush.bf16.msrb.mxu0 %v3357_v13 }
 0x13e   :  { %1768 = vmatpush.bf16.msra.mxu1 %v3233_v62  ;;  %v3397_v62 = vor.u32 %v3867_v59, %v3396_v58  ;;  %v3417_v59 = vor.u32 %v3870_v52, %v3414_v54  ;;  %v3533_v52 = vor.u32 %v3901_v44, %v3532_v51  ;;  %v3470_v54 = vld [vmem:[#allocation6 + $0x138] sm:$0xf0] }
 0x140   :  { %2192 = vmatpush.bf16.msra.mxu2 %v3397_v62  ;;  %2202 = vmatpush.bf16.msra.mxu3 %v3485_v2  ;;  %v3879_v62 = vld [vmem:[#allocation6 + $0x104] sm:$0xf0]  ;;  %v3556_v2 = vld [vmem:[#allocation6 + $0x1e0] sm:$0xf] }
 0x141   :  { %2177 = vmatpush.bf16.msrb.mxu0 %v3349_v17 }
 0x142   :  { %1769 = vmatpush.bf16.msra.mxu1 %v3217_v1  ;;  %v3358_v1 = vld [vmem:[#allocation6 + $0x58] sm:$0xf0] }
 0x143   :  { %v1579_v16 = vpop.f32.mrf.mxu0  ;;  %v3361_v4 = vor.u32 %v3856_v48, %v3358_v1  ;;  %v3445_v48 = vor.u32 %v3879_v62, %v3444_v60  ;;  %v3909_v1 = vld [vmem:[#allocation6 + $0x1f4] sm:$0xf0] }
 0x144   :  { %v3476_v16 = vld [vmem:[#allocation6 + $0x140] sm:$0xf]  ;;  %v3565_v7 = vor.u32 %v3909_v1, %v3564_v63  ;;  %v3882_v1 = vld [vmem:[#allocation6 + $0x124] sm:$0xf] }
 0x145   :  { %2178 = vmatpush.bf16.msrb.mxu0 %v3341_v22  ;;  %v3477_v22 = vor.u32 %v3887_v19, %v3476_v16  ;;  %v3890_v16 = vld [vmem:[#allocation6 + $0x164] sm:$0xf]  ;;  %v3401_v19 = vor.u32 %v3866_v14, %v3398_v15  ;;  %v3524_v63 = vld [vmem:[#allocation6 + $0x1a0] sm:$0xf] }
 0x146   :  { %1770 = vmatpush.bf16.msra.mxu1 %v3201_v10  ;;  %v3389_v10 = vor.u32 %v3865_v6, %v3388_v5 }
 0x147   :  { %2203 = vmatpush.bf16.msra.mxu3 %v3477_v22  ;;  %v3497_v22 = vor.u32 %v3890_v16, %v3494_v20 }
 0x148   :  { %2193 = vmatpush.bf16.msra.mxu2 %v3389_v10 }
 0x149   :  { %1771 = vmatmul.bf16.vlgmr.msra.gmra.mxu1 %v4169_v37  ;;  %2179 = vmatpush.bf16.msrb.mxu0 %v3333_v26  ;;  %v3468_v26 = vld [vmem:[#allocation6 + $0x130] sm:$0xf] }
 0x14a   :  { %v3469_v29 = vor.u32 %v3885_v27, %v3468_v26  ;;  %2213 = vmatpush.bf16.msrb.mxu1 %v3565_v7  ;;  %v3864_v26 = vld [vmem:[#allocation6 + $0x94] sm:$0xf]  ;;  %v3390_v27 = vld [vmem:[#allocation6 + $0x98] sm:$0xf0]  ;;  %v3897_v7 = vld [vmem:[#allocation6 + $0x194] sm:$0xf0] }
 0x14b   :  { %v4181_v37 = vpop.f32.mrf.mxu0 }
 0x14c   :  { %2194 = vmatpush.bf16.msra.mxu2 %v3381_v18  ;;  %2204 = vmatpush.bf16.msra.mxu3 %v3469_v29 }
 0x14d   :  { %2180 = vmatpush.bf16.msrb.mxu0 %v3325_v33  ;;  %v3337_v33 = vor.u32 %v3850_v28, %v3334_v30  ;;  %v3888_v28 = vld [vmem:[#allocation6 + $0x154] sm:$0xf]  ;;  %v3393_v30 = vor.u32 %v3864_v26, %v3390_v27  ;;  %v3906_v27 = vld [vmem:[#allocation6 + $0x1e4] sm:$0xf] }
 0x150   :  { %2239 = vmatpush.bf16.msrb.mxu2 %v3441_v25  ;;  %v3549_v25 = vor.u32 %v3905_v24, %v3548_v23 }
 0x151   :  { %2181 = vmatpush.bf16.msrb.mxu0 %v3317_v39  ;;  %v3848_v39 = vld [vmem:[#allocation6 + $0x14] sm:$0xf] }
 0x152   :  { %v3329_v42 = vor.u32 %v3848_v39, %v3326_v40  ;;  %v3382_v39 = vld [vmem:[#allocation6 + $0x88] sm:$0xf0]  ;;  %v3886_v40 = vld [vmem:[#allocation6 + $0x144] sm:$0xf] }
 0x153   :  { %v1631_v38 = vpop.f32.mrf.mxu0 }
 0x154   :  { %2240 = vmatpush.bf16.msrb.mxu2 %v3433_v34  ;;  %v3461_v38 = vor.u32 %v3883_v36, %v3460_v56  ;;  %v3540_v56 = vld [vmem:[#allocation6 + $0x1c0] sm:$0xf]  ;;  %v3903_v36 = vld [vmem:[#allocation6 + $0x1c4] sm:$0xf0] }
 0x155   :  { %2226 = vmatpush.bf16.msra.mxu0 %v3377_v46  ;;  %v3425_v46 = vor.u32 %v3872_v41, %v3422_v45 }
 0x156   :  { %2205 = vmatpush.bf16.msra.mxu3 %v3461_v38  ;;  %v3862_v38 = vld [vmem:[#allocation6 + $0x84] sm:$0xf] }
 0x157   :  { %v3385_v45 = vor.u32 %v3862_v38, %v3382_v39  ;;  %v3902_v38 = vld [vmem:[#allocation6 + $0x1c4] sm:$0xf]  ;;  %v3542_v39 = vld [vmem:[#allocation6 + $0x1c8] sm:$0xf0] }
 0x158   :  { %2241 = vmatpush.bf16.msrb.mxu2 %v3425_v46  ;;  %v3478_v46 = vld [vmem:[#allocation6 + $0x148] sm:$0xf0] }
 0x159   :  { %2227 = vmatpush.bf16.msra.mxu0 %v3369_v55  ;;  %v4192_v55 = vld [vmem:[%s4222_s4] sm:$0xf]  ;;  %v3481_v49 = vor.u32 %v3886_v40, %v3478_v46 }
 0x15a   :  { %2206 = vmatpush.bf16.msra.mxu3 %v3453_v50  ;;  %v920_v5 = vperm.slane %v4192_v55, 0 }
 0x15b   :  { %v4185_v61 = vpop.f32.mrf.mxu0 }
 0x15c   :  { %v4183_v57 = vpop.f32.mrf.mxu2  ;;  %2242 = vmatpush.bf16.msrb.mxu2 %v3417_v59 }
 0x15d   :  { %2228 = vmatpush.bf16.msra.mxu0 %v3361_v4  ;;  %v3406_v4 = vld [vmem:[#allocation6 + $0xb8] sm:$0xf0] }
 0x15e   :  { %v3409_v10 = vor.u32 %v3868_v3, %v3406_v4  ;;  %2207 = vmatpush.bf16.msra.mxu3 %v3445_v48  ;;  %v3899_v48 = vld [vmem:[#allocation6 + $0x1a4] sm:$0xf0]  ;;  %v3462_v4 = vld [vmem:[#allocation6 + $0x128] sm:$0xf0] }
 0x15f   :  { %v3525_v3 = vor.u32 %v3899_v48, %v3524_v63  ;;  %v3510_v63 = vld [vmem:[#allocation6 + $0x188] sm:$0xf0] }
 0x160   :  { %2243 = vmatpush.bf16.msrb.mxu2 %v3409_v10 }
 0x161   :  { %2229 = vmatpush.bf16.msra.mxu0 %v3353_v12  ;;  %v3907_v12 = vld [vmem:[#allocation6 + $0x1e4] sm:$0xf0] }
 0x162   :  { %2252 = vmatpush.bf16.msrb.mxu3 %v3505_v0 }
 0x163   :  { %v1683_v17 = vpop.f32.mrf.mxu0 }
 0x164   :  { %v1592_v13 = vpop.f32.mrf.mxu2  ;;  %v1578_v17 = vadd.f32 %v4178_v11, %v920_v5  ;;  %2244 = vmatpush.bf16.msrb.mxu2 %v3401_v19  ;;  %v3465_v5 = vor.u32 %v3882_v1, %v3462_v4  ;;  %v3895_v19 = vld [vmem:[#allocation6 + $0x184] sm:$0xf0]  ;;  %v923_v1 = vperm.slane %v4192_v55, 3 }
 0x165   :  { %2230 = vmatpush.bf16.msra.mxu0 %v3345_v43  ;;  %v3557_v13 = vor.u32 %v3907_v12, %v3556_v2  ;;  %v3457_v12 = vor.u32 %v3880_v8, %v3454_v9 }
 0x166   :  { %v1591_v43 = vadd.f32 %v4183_v57, %v1578_v17  ;;  %2253 = vmatpush.bf16.msrb.mxu3 %v3497_v22  ;;  %v3541_v57 = vor.u32 %v3903_v36, %v3540_v56  ;;  %v3508_v17 = vld [vmem:[#allocation6 + $0x180] sm:$0xf]  ;;  %v3878_v22 = vld [vmem:[#allocation6 + $0x104] sm:$0xf] }
 0x167   :  { %2214 = vmatpush.bf16.msrb.mxu1 %v3557_v13  ;;  %v3509_v20 = vor.u32 %v3895_v19, %v3508_v17  ;;  %v3913_v19 = vld [vmem:[#allocation7 + $0x18] sm:$0xff] }
 0x168   :  { %2245 = vmatpush.bf16.msrb.mxu2 %v3393_v30 }
 0x169   :  { %2231 = vmatpush.bf16.msra.mxu0 %v3337_v33  ;;  %v3489_v33 = vor.u32 %v3888_v28, %v3486_v31  ;;  %v3558_v28 = vld [vmem:[#allocation6 + $0x1e8] sm:$0xf0] }
 0x16a   :  { %v3561_v30 = vor.u32 %v3906_v27, %v3558_v28  ;;  %v3921_v27 = vld [vmem:[#allocation7 + $0x58] sm:$0xff]  ;;  %v3920_v28 = vld [vmem:[#allocation7 + $0x50] sm:$0xff] }
 0x16b   :  { %2215 = vmatpush.bf16.msrb.mxu1 %v3549_v25  ;;  %2254 = vmatpush.bf16.msrb.mxu3 %v3489_v33  ;;  %v3566_v25 = vld [vmem:[#allocation6 + $0x1f8] sm:$0xf0]  ;;  %v3904_v33 = vld [vmem:[#allocation6 + $0x1d4] sm:$0xf] }
 0x16c   :  { %v4187_v35 = vpop.f32.mrf.mxu2  ;;  %2246 = vmatpush.bf16.msrb.mxu2 %v3385_v45 }
 0x16d   :  { %2232 = vmatpush.bf16.msra.mxu0 %v3329_v42 }
 0x16f   :  { %2216 = vmatpush.bf16.msrb.mxu1 %v3541_v57  ;;  %2255 = vmatpush.bf16.msrb.mxu3 %v3481_v49  ;;  %v3900_v49 = vld [vmem:[#allocation6 + $0x1b4] sm:$0xf] }
 0x171   :  { %2233 = vmatpush.bf16.msra.mxu0 %v3321_v53  ;;  %v3884_v53 = vld [vmem:[#allocation6 + $0x134] sm:$0xf] }
 0x172   :  { %v3473_v60 = vor.u32 %v3884_v53, %v3470_v54  ;;  %v3898_v53 = vld [vmem:[#allocation6 + $0x1a4] sm:$0xf] }
 0x173   :  { %2217 = vmatpush.bf16.msrb.mxu1 %v3533_v52 }
 0x174   :  { %v1644_v58 = vpop.f32.mrf.mxu2  ;;  %2256 = vmatpush.bf16.msrb.mxu3 %v3473_v60 }
 0x175   :  { %v921_v58 = vperm.slane %v4192_v55, 1 }
 0x177   :  { %v1630_v10 = vadd.f32 %v4181_v37, %v921_v58  ;;  %2218 = vmatpush.bf16.msrb.mxu1 %v3525_v3  ;;  %v3908_v37 = vld [vmem:[#allocation6 + $0x1f4] sm:$0xf]  ;;  %v3518_v58 = vld [vmem:[#allocation6 + $0x198] sm:$0xf0] }
 0x178   :  { %2257 = vmatpush.bf16.msrb.mxu3 %v3465_v5 }
 0x179   :  { %v1643_v0 = vadd.f32 %v4187_v35, %v1630_v10  ;;  %v3569_v35 = vor.u32 %v3908_v37, %v3566_v25 }
 0x17a   :  { %v1603_v6 = vpop.f32.mrf.mxu3 }
 0x17b   :  { %v4196_v18 = vpop.f32.mrf.mxu0  ;;  %v1604_v29 = vadd.f32 %v1603_v6, %v1591_v43  ;;  %v3516_v6 = vld [vmem:[#allocation6 + $0x190] sm:$0xf]  ;;  %v3446_v43 = vld [vmem:[#allocation6 + $0x108] sm:$0xf0] }
 0x17c   :  { %v4198_v21 = vpop.f32.mrf.mxu2  ;;  %v3517_v2 = vor.u32 %v3897_v7, %v3516_v6  ;;  %2258 = vmatpush.bf16.msrb.mxu3 %v3457_v12  ;;  %v3449_v24 = vor.u32 %v3878_v22, %v3446_v43  ;;  %v1734_v4 = vadd.f32 %v4196_v18, %v923_v1  ;;  %v3917_v12 = vld [vmem:[#allocation7 + $0x38] sm:$0xff]  ;;  %v3912_v22 = vld [vmem:[#allocation7 + $0x10] sm:$0xff] }
 0x17d   :  { %v3925_v18 = vld [vmem:[#allocation7 + $0x78] sm:$0xff]  ;;  %v3924_v43 = vld [vmem:[#allocation7 + $0x70] sm:$0xff] }
 0x17e   :  { %2219 = vmatpush.bf16.msrb.mxu1 %v3517_v2 }
 0x180   :  { %2259 = vmatpush.bf16.msrb.mxu3 %v3449_v24  ;;  %v3923_v24 = vld [vmem:[#allocation7 + $0x68] sm:$0xff] }
 0x182   :  { %v1605_v11 = vpop.f32.mrf.mxu3  ;;  %2220 = vmatpush.bf16.msrb.mxu1 %v3509_v20 }
 0x183   :  { %v1735_v42 = vpop.f32.mrf.mxu0 }
 0x184   :  { %v1696_v47 = vpop.f32.mrf.mxu2  ;;  %v3545_v42 = vor.u32 %v3902_v38, %v3542_v39 }
 0x186   :  { %v1616_v32 = vpop.f32.mrf.mxu1  ;;  %2265 = vmatpush.bf16.msra.mxu1 %v3569_v35  ;;  %v3910_v35 = vld [vmem:[#allocation7] sm:$0xff] }
 0x187   :  { %v1617_v34 = vadd.f32 %v1616_v32, %v1604_v29  ;;  %v922_v29 = vperm.slane %v4192_v55, 2  ;;  %v3915_v55 = vld [vmem:[#allocation7 + $0x28] sm:$0xff] }
 0x189   :  { %v1776_v41 = vmax.f32 %v1617_v34, 0.0  ;;  %v3550_v34 = vld [vmem:[#allocation6 + $0x1d8] sm:$0xf0]  ;;  %v1682_v56 = vadd.f32 %v4185_v61, %v922_v29  ;;  %v3526_v61 = vld [vmem:[#allocation6 + $0x1a8] sm:$0xf0] }
 0x18a   :  { %v1655_v59 = vpop.f32.mrf.mxu3  ;;  %2266 = vmatpush.bf16.msra.mxu1 %v3561_v30  ;;  %v3553_v36 = vor.u32 %v3904_v33, %v3550_v34  ;;  %v3529_v54 = vor.u32 %v3898_v53, %v3526_v61  ;;  %v3919_v30 = vld [vmem:[#allocation7 + $0x48] sm:$0xff]  ;;  %v3918_v33 = vld [vmem:[#allocation7 + $0x40] sm:$0xff] }
 0x18b   :  { %v1780_v50 = vpack.c.bf16 %v1776_v41, %v1776_v41  ;;  %v1656_v13 = vadd.f32 %v1655_v59, %v1643_v0  ;;  %v1695_v57 = vadd.f32 %v4198_v21, %v1682_v56  ;;  %v3896_v21 = vld [vmem:[#allocation6 + $0x194] sm:$0xf]  ;;  %v1848_v34 = vld [vmem:[%s4224_s6] sm:$0x3] }
 0x18c   :  { %v3521_v60 = vor.u32 %v3896_v21, %v3518_v58  ;;  %v1850_v56 = vperm.slane %v1848_v34, 0 }
 0x18d   :  { %2182 = vmatmul.bf16.vlgmr.msrb.gmra.mxu0 %v1780_v50 }
 0x18e   :  { %v1618_v62 = vpop.f32.mrf.mxu1  ;;  %2267 = vmatpush.bf16.msra.mxu1 %v3553_v36  ;;  %2414 = vmatpush.bf16.msrb.mxu0 %v3917_v12 }
 0x18f   :  { %v3894_v62 = vld [vmem:[#allocation6 + $0x184] sm:$0xf] }
 0x190   :  { %v3513_v48 = vor.u32 %v3894_v62, %v3510_v63  ;;  %v3936_v62 = vld [vmem:[%s4226_s8] ss:$0 sm:$0xff] }
 0x192   :  { %v1657_v14 = vpop.f32.mrf.mxu3  ;;  %2268 = vmatpush.bf16.msra.mxu1 %v3545_v42 }
 0x193   :  { %v3916_v14 = vld [vmem:[#allocation7 + $0x30] sm:$0xff] }
 0x194   :  { %2415 = vmatpush.bf16.msrb.mxu0 %v3916_v14 }
 0x196   :  { %v1668_v15 = vpop.f32.mrf.mxu1 }
 0x197   :  { %v1669_v16 = vadd.f32 %v1668_v15, %v1656_v13 }
 0x198   :  { %2416 = vmatpush.bf16.msrb.mxu0 %v3915_v55 }
 0x199   :  { %v1777_v23 = vmax.f32 %v1669_v16, 0.0  ;;  %v3914_v16 = vld [vmem:[#allocation7 + $0x20] sm:$0xff] }
 0x19a   :  { %v1707_v11 = vpop.f32.mrf.mxu3 }
 0x19b   :  { %v1781_v26 = vpack.c.bf16 %v1777_v23, %v1777_v23  ;;  %v1708_v40 = vadd.f32 %v1707_v11, %v1695_v57  ;;  %v3911_v23 = vld [vmem:[#allocation7 + $0x8] sm:$0xff] }
 0x19c   :  { %v1746_v32 = vpop.f32.mrf.mxu2  ;;  %2417 = vmatpush.bf16.msrb.mxu0 %v3914_v16 }
 0x19d   :  { %2195 = vmatmul.bf16.vlgmr.msra.gmra.mxu2 %v1781_v26  ;;  %2234 = vmatmul.bf16.vlgmr.msra.gmra.mxu0 %v1780_v50  ;;  %v3534_v50 = vld [vmem:[#allocation6 + $0x1b8] sm:$0xf0]  ;;  %v1747_v5 = vadd.f32 %v1746_v32, %v1734_v4 }
 0x19e   :  { %v1670_v31 = vpop.f32.mrf.mxu1  ;;  %v3537_v44 = vor.u32 %v3900_v49, %v3534_v50  ;;  %2427 = vmatpush.bf16.msra.mxu2 %v3925_v18 }
 0x1a0   :  { %2269 = vmatpush.bf16.msra.mxu1 %v3537_v44  ;;  %2418 = vmatpush.bf16.msrb.mxu0 %v3913_v19 }
 0x1a2   :  { %v1709_v41 = vpop.f32.mrf.mxu3  ;;  %2428 = vmatpush.bf16.msra.mxu2 %v3924_v43 }
 0x1a4   :  { %v1748_v47 = vpop.f32.mrf.mxu2  ;;  %2270 = vmatpush.bf16.msra.mxu1 %v3529_v54  ;;  %2419 = vmatpush.bf16.msrb.mxu0 %v3912_v22 }
 0x1a5   :  { %v1851_v47 = vperm.slane %v1848_v34, 1 }
 0x1a6   :  { %v1720_v45 = vpop.f32.mrf.mxu1  ;;  %2429 = vmatpush.bf16.msra.mxu2 %v3923_v24 }
 0x1a7   :  { %v1721_v46 = vadd.f32 %v1720_v45, %v1708_v40 }
 0x1a8   :  { %2271 = vmatpush.bf16.msra.mxu1 %v3521_v60  ;;  %2420 = vmatpush.bf16.msrb.mxu0 %v3911_v23  ;;  %v2440_v60 = vlaneseq }
 0x1a9   :  { %v1778_v51 = vmax.f32 %v1721_v46, 0.0 }
 0x1aa   :  { %v2441_v63 = vand.u32 127, %v2440_v60 }
 0x1ab   :  { %v1782_v52 = vpack.c.bf16 %v1778_v51, %v1778_v51 }
 0x1ac   :  { %2272 = vmatpush.bf16.msra.mxu1 %v3513_v48  ;;  %2421 = vmatpush.bf16.msrb.mxu0 %v3910_v35  ;;  %vm2442_vm1 = vcmp.lt.s32.totalorder %v2441_v63, 3 }
 0x1ad   :  { %2208 = vmatmul.bf16.vlgmr.msra.gmra.mxu3 %v1782_v52  ;;  %2247 = vmatmul.bf16.vlgmr.msrb.gmra.mxu2 %v1781_v26  ;;  %v3922_v26 = vld [vmem:[#allocation7 + $0x60] sm:$0xff] }
 0x1ae   :  { %v1722_v59 = vpop.f32.mrf.mxu1  ;;  %2430 = vmatpush.bf16.msra.mxu2 %v3922_v26 }
 0x1b2   :  { %2431 = vmatpush.bf16.msra.mxu2 %v3921_v27 }
 0x1b6   :  { %2432 = vmatpush.bf16.msra.mxu2 %v3920_v28 }
 0x1ba   :  { %v1759_v3 = vpop.f32.mrf.mxu3  ;;  %2433 = vmatpush.bf16.msra.mxu2 %v3919_v30 }
 0x1bb   :  { %v1760_v6 = vadd.f32 %v1759_v3, %v1747_v5 }
 0x1bd   :  { %2260 = vmatmul.bf16.vlgmr.msrb.gmra.mxu3 %v1782_v52 }
 0x1be   :  { %2434 = vmatpush.bf16.msra.mxu2 %v3918_v33 }
 0x1c2   :  { %v1761_v7 = vpop.f32.mrf.mxu3 }
 0x1c6   :  { %v1772_v10 = vpop.f32.mrf.mxu1 }
 0x1c7   :  { %v1773_v8 = vadd.f32 %v1772_v10, %v1760_v6 }
 0x1c9   :  { %v1779_v9 = vmax.f32 %v1773_v8, 0.0 }
 0x1cb   :  { %v1783_v0 = vpack.c.bf16 %v1779_v9, %v1779_v9 }
 0x1cd   :  { %2221 = vmatmul.bf16.vlgmr.msrb.gmra.mxu1 %v1783_v0 }
 0x1ce   :  { %v1774_v2 = vpop.f32.mrf.mxu1 }
 0x1dd   :  { %2273 = vmatmul.bf16.vlgmr.msra.gmra.mxu1 %v1783_v0 }
 0x20a   :  { %v2183_v13 = vpop.f32.mrf.mxu0 }
 0x20b   :  { %v2184_v57 = vadd.f32 %v2183_v13, %v1850_v56 }
 0x212   :  { %v2185_v15 = vpop.f32.mrf.mxu0 }
 0x21a   :  { %v2235_v17 = vpop.f32.mrf.mxu0 }
 0x21b   :  { %v2236_v50 = vadd.f32 %v2235_v17, %v1851_v47 }
 0x220   :  { %v2196_v20 = vpop.f32.mrf.mxu2 }
 0x221   :  { %v2197_v38 = vadd.f32 %v2196_v20, %v2184_v57 }
 0x222   :  { %v2237_v37 = vpop.f32.mrf.mxu0 }
 0x228   :  { %v2198_v25 = vpop.f32.mrf.mxu2 }
 0x230   :  { %v2209_v29 = vpop.f32.mrf.mxu3  ;;  %v2248_v11 = vpop.f32.mrf.mxu2 }
 0x231   :  { %v2210_v39 = vadd.f32 %v2209_v29, %v2197_v38  ;;  %v2249_v51 = vadd.f32 %v2248_v11, %v2236_v50 }
 0x238   :  { %v2211_v31 = vpop.f32.mrf.mxu3  ;;  %v2250_v32 = vpop.f32.mrf.mxu2 }
 0x240   :  { %v2261_v36 = vpop.f32.mrf.mxu3 }
 0x241   :  { %v2262_v44 = vadd.f32 %v2261_v36, %v2249_v51 }
 0x248   :  { %v2263_v42 = vpop.f32.mrf.mxu3 }
 0x24a   :  { %v2222_v40 = vpop.f32.mrf.mxu1 }
 0x24b   :  { %v2223_v41 = vadd.f32 %v2222_v40, %v2210_v39 }
 0x24d   :  { %v2278_v45 = vmax.f32 %v2223_v41, 0.0 }
 0x24f   :  { %v2280_v46 = vpack.c.bf16 %v2278_v45, %v2278_v45 }
 0x251   :  { %2422 = vmatmul.bf16.vlgmr.msrb.gmra.mxu0 %v2280_v46 }
 0x252   :  { %v2224_v49 = vpop.f32.mrf.mxu1 }
 0x25a   :  { %v2274_v52 = vpop.f32.mrf.mxu1 }
 0x25b   :  { %v2275_v53 = vadd.f32 %v2274_v52, %v2262_v44 }
 0x25d   :  { %v2279_v61 = vmax.f32 %v2275_v53, 0.0 }
 0x25f   :  { %v2281_v54 = vpack.c.bf16 %v2279_v61, %v2279_v61 }
 0x261   :  { %2435 = vmatmul.bf16.vlgmr.msra.gmra.mxu2 %v2281_v54 }
 0x262   :  { %v2276_v21 = vpop.f32.mrf.mxu1 }
 0x2ce   :  { %v2423_v58 = vpop.f32.mrf.mxu0 }
 0x2cf   :  { %v2424_v48 = vadd.f32 %v3936_v62, %v2423_v58 }
 0x2d6   :  { %v2425_v59 = vpop.f32.mrf.mxu0 }
 0x2e4   :  { %v2436_v1 = vpop.f32.mrf.mxu2 }
 0x2e5   :  { %v2437_v3 = vadd.f32 %v2436_v1, %v2424_v48 }
 0x2e7   :  { %v2443_v4 = vsel %vm2442_vm1, %v2437_v3, -1e+30 }
 0x2e8   :  { %2444 = vmax.xlane.f32.xlu0 %v2443_v4 }
 0x2ec   :  { %v2438_v5 = vpop.f32.mrf.mxu2 }
 0x35b   :  { %v2445_v6 = vpop.xlane.xlu0 %2444 }
 0x35c   :  { %v2446_v7 = vsub.f32 %v2443_v4, %v2445_v6 }
 0x35e   :  { %v2447_v10 = vmul.f32 1.442695, %v2446_v7 }
 0x360   :  { %3937 = vpow2.f32 %v2447_v10 }
 0x366   :  { %v3938_v8 = vpop.eup %3937 }
 0x367   :  { %2449 = vadd.xlane.f32.xlu0 %v3938_v8 }
 0x3da   :  { %v2450_v9 = vpop.xlane.xlu0 %2449 }
 0x3db   :  { %3939 = vlog2.f32 %v2450_v9 }
 0x3e1   :  { %v3940_v0 = vpop.eup %3939 }
 0x3e2   :  { %v2452_v2 = vmul.f32 0.6931472, %v3940_v0 }
 0x3e4   :  { %v2453_v12 = vsub.f32 %v2446_v7, %v2452_v2 }
 0x3e6   :  { %2454 = vst [vmem:[%s4227_s9] sm:$0xff] %v2453_v12 }
 0x3e7   :  { %2459 = vsyncpa [#allocation3], 1 }
 0x3e8   :  { %2460 = vsyncpa [#allocation5], 1 }
 0x3e9   :  { %2461 = vsyncpa [#allocation8], 1 }

</bundles_post_ra>
